<compile_context>
chip_gen: v7x
topology: tpu7x:2x2x1
jax: 0.10.0
libtpu: 0.0.40
codegen_flags: <defaults>
</compile_context>

<pallas_src>
import functools

import jax
import jax.numpy as jnp
from jax import lax
from jax.experimental import pallas as pl
from jax.experimental.pallas import tpu as pltpu

_EPS = 1e-12  # matches torch.nn.functional.normalize default eps


def _contrastive_kernel(ia_ref, ib_ref, ca_ref, cb_ref, out_ref, *, inv_temp, t_len):
    # Blocks are (bm, T, C); T (sublane) and C (lane) are kept whole because
    # normalization / logsumexp need full rows.
    # TODO(synk): for production shapes with C < 128 a batch-on-lanes layout
    # (block (T, C, bm)) would raise lane occupancy, but the wrapper-side
    # transpose would itself stream all 4 tensors through HBM, so it is only
    # worthwhile if the producer can emit that layout directly.
    ia = ia_ref[...].astype(jnp.float32)
    ib = ib_ref[...].astype(jnp.float32)
    ca = ca_ref[...].astype(jnp.float32)
    cb = cb_ref[...].astype(jnp.float32)

    # sum-over-T then L2-normalize == mean-over-T then L2-normalize; the eps
    # threshold is scaled by T so torch's  mean / max(||mean||, eps)  is exact.
    eps_sq_q = (t_len * _EPS) ** 2
    eps_sq_neg = _EPS * _EPS

    def unit_sum(x):
        s = jnp.sum(x, axis=1)                                              # (bm, C)
        inv = lax.rsqrt(jnp.maximum(jnp.sum(s * s, axis=-1, keepdims=True), eps_sq_q))
        return s * inv                                                      # (bm, C)

    q_ia = unit_sum(ia)
    q_ib = unit_sum(ib)
    q_ca = unit_sum(ca)
    q_cb = unit_sum(cb)

    # Per-row inverse norms of each negative bank (scaled by 1/T), computed once
    # and shared by the two NCE terms using that bank; the normalized (bm, T, C)
    # negatives are never materialized.
    inv_cb = lax.rsqrt(jnp.maximum(jnp.sum(cb * cb, axis=-1), eps_sq_neg)) * inv_temp  # (bm, T)
    inv_ca = lax.rsqrt(jnp.maximum(jnp.sum(ca * ca, axis=-1), eps_sq_neg)) * inv_temp  # (bm, T)

    def nce_pair(qa, qb, neg, inv_scaled):
        # Fuses the two NCE terms that share the positive pair (qa, qb) and the
        # negative bank `neg`: one batched dot sweep over `neg` for both queries,
        # one shared positive logit (qa.qb == qb.qa).
        l_pos = jnp.sum(qa * qb, axis=-1, keepdims=True) * inv_temp        # (bm, 1)
        q_pair = jnp.stack([qa, qb], axis=1)                               # (bm, 2, C)
        l_neg = jnp.einsum('npc,ntc->npt', q_pair, neg,
                           preferred_element_type=jnp.float32)             # (bm, 2, T)
        l_neg = l_neg * inv_scaled[:, None, :]
        # cross-entropy with label 0 == logsumexp(logits) - l_pos
        m = jnp.maximum(l_pos, jnp.max(l_neg, axis=-1))                    # (bm, 2)
        lse = m + jnp.log(jnp.exp(l_pos - m)
                          + jnp.sum(jnp.exp(l_neg - m[:, :, None]), axis=-1))
        return lse - l_pos                                                 # (bm, 2)

    total = jnp.sum(nce_pair(q_ia, q_ca, cb, inv_cb)
                    + nce_pair(q_ib, q_cb, ca, inv_ca), axis=-1)           # (bm,)
    out_ref[...] = total.reshape(out_ref.shape)                            # (1, 1, bm)


def _vmem_capacity_bytes():
    try:
        return int(pltpu.get_tpu_info().vmem_capacity_bytes)
    except Exception:
        return 64 << 20  # conservative fallback (v7x per-TC VMEM)


def _pick_block_b(n, t, c, itemsize, budget_bytes):
    """Largest TPU-friendly batch block whose (bm, T, C) input tile fits the budget,
    preferring >=2 grid steps so both v7x TensorCores get work."""
    per_row = t * c * itemsize
    cands = [bm for bm in range(1, n + 1)
             if n % bm == 0 and (bm == n or bm % 8 == 0)]
    fitting = [bm for bm in cands if bm * per_row <= budget_bytes]
    if not fitting:
        # TODO(synk): if even the smallest block exceeds the budget (huge T*C), T
        # needs its own "arbitrary" grid axis with running accumulators.
        return min(cands)
    multi = [bm for bm in fitting if n // bm >= 2]
    return max(multi) if multi else max(fitting)


def contrastive_loss(ia, ib, ca, cb, *, temperature=0.1, block_b=None):
    """ContrastiveLoss.forward with contrast_pairs = {'IA': ia, 'IB': ib, 'CA': ca, 'CB': cb}."""
    assert ia.shape == ib.shape == ca.shape == cb.shape
    assert ia.dtype == ib.dtype == ca.dtype == cb.dtype
    n, t, c = ia.shape
    itemsize = jnp.dtype(ia.dtype).itemsize

    vmem_cap = _vmem_capacity_bytes()
    block_budget = max(vmem_cap // 32, 1 << 20)
    bm = block_b if block_b is not None else _pick_block_b(n, t, c, itemsize, block_budget)
    assert n % bm == 0 and (bm == n or bm % 8 == 0), (n, bm)
    grid = n // bm

    in_spec = pl.BlockSpec((bm, t, c), lambda i: (i, 0, 0))
    out_spec = pl.BlockSpec((1, 1, bm), lambda i: (i, 0, 0))

    # 4 inputs x 2 pipeline buffers (input dtype) + in-kernel f32 copies/temporaries
    # + headroom, clamped to ~70% of this generation's physical VMEM.
    per_block_in = bm * t * c * itemsize
    per_block_f32 = bm * t * c * 4
    need = 4 * 2 * per_block_in + 8 * per_block_f32 + (4 << 20)
    vmem_limit = int(min(max(need, 8 << 20), int(0.7 * vmem_cap)))

    kernel = functools.partial(_contrastive_kernel,
                               inv_temp=1.0 / temperature, t_len=float(t))
    per_sample = pl.pallas_call(
        kernel,
        out_shape=jax.ShapeDtypeStruct((grid, 1, bm), jnp.float32),
        grid=(grid,),
        in_specs=[in_spec, in_spec, in_spec, in_spec],
        out_specs=out_spec,
        compiler_params=pltpu.CompilerParams(
            dimension_semantics=("parallel",),
            vmem_limit_bytes=vmem_limit),
    )(ia, ib, ca, cb)

    # per_sample already sums the 4 NCE terms per sample; the batch mean of that
    # sum equals the sum of the 4 per-term CrossEntropy means.
    return jnp.sum(per_sample) / n


# ---------------------------------------------------------------------------
# Pure-JAX reference (mirrors the PyTorch module numerics).
# ---------------------------------------------------------------------------
def _l2_normalize(x, axis, eps=_EPS):
    norm = jnp.sqrt(jnp.sum(x * x, axis=axis, keepdims=True))
    return x / jnp.maximum(norm, eps)


def _nce_ref(q, k, neg, temperature=0.1):
    q = _l2_normalize(q, axis=1)
    k = _l2_normalize(k, axis=1)
    neg = jnp.transpose(neg, (0, 2, 1))          # (N, C, T)
    neg = _l2_normalize(neg, axis=1)
    l_pos = jnp.sum(q * k, axis=1, keepdims=True)            # (N, 1)
    l_neg = jnp.einsum('nc,nck->nk', q, neg)                  # (N, T)
    logits = jnp.concatenate([l_pos, l_neg], axis=1) / temperature
    m = jnp.max(logits, axis=1, keepdims=True)
    lse = m[:, 0] + jnp.log(jnp.sum(jnp.exp(logits - m), axis=1))
    return jnp.mean(lse - logits[:, 0])          # CE with label 0


def contrastive_loss_ref(ia, ib, ca, cb, temperature=0.1):
    q_ia, q_ib = jnp.mean(ia, axis=1), jnp.mean(ib, axis=1)
    q_ca, q_cb = jnp.mean(ca, axis=1), jnp.mean(cb, axis=1)
    return (_nce_ref(q_ia, q_ca, cb, temperature)
            + _nce_ref(q_ib, q_cb, ca, temperature)
            + _nce_ref(q_ca, q_ia, cb, temperature)
            + _nce_ref(q_cb, q_ib, ca, temperature))


if __name__ == "__main__":
    key = jax.random.PRNGKey(0)
    k_ia, k_ib, k_ca, k_cb = jax.random.split(key, 4)

    # contrast_pairs['IA'/'IB'/'CA'/'CB']: (batch, temporal snippets, feature dim)
    N, T, C = 16, 8, 32
    ia = jax.random.normal(k_ia, (N, T, C), dtype=jnp.float32)
    ib = jax.random.normal(k_ib, (N, T, C), dtype=jnp.float32)
    ca = jax.random.normal(k_ca, (N, T, C), dtype=jnp.float32)
    cb = jax.random.normal(k_cb, (N, T, C), dtype=jnp.float32)

    # Auto-picked bm prefers >=2 grid steps (here bm=8, grid=(2,)) so the tiled,
    # batch-parallel path is actually exercised.
    out = jax.block_until_ready(contrastive_loss(ia, ib, ca, cb))
    ref = contrastive_loss_ref(ia, ib, ca, cb)
    assert jnp.allclose(out, ref, rtol=1e-5, atol=1e-4), (out, ref)

    # bf16 input path (halved DMA bytes): compare against the f32 reference on the
    # same bf16-rounded values; the kernel upcasts to f32 internally.
    ia_b, ib_b, ca_b, cb_b = (x.astype(jnp.bfloat16) for x in (ia, ib, ca, cb))
    out_b = jax.block_until_ready(contrastive_loss(ia_b, ib_b, ca_b, cb_b))
    ref_b = contrastive_loss_ref(*(x.astype(jnp.float32) for x in (ia_b, ib_b, ca_b, cb_b)))
    assert jnp.allclose(out_b, ref_b, rtol=1e-3, atol=1e-3), (out_b, ref_b)

    print("KERNEL_OK")
</pallas_src>

<mosaic_0001>
module attributes {stable_mosaic.version = 11 : i64} {
  func.func @_contrastive_kernel(%arg0: i32, %arg1: memref<8x8x32xf32, #tpu.memory_space<vmem>>, %arg2: memref<8x8x32xf32, #tpu.memory_space<vmem>>, %arg3: memref<8x8x32xf32, #tpu.memory_space<vmem>>, %arg4: memref<8x8x32xf32, #tpu.memory_space<vmem>>, %arg5: memref<1x1x8xf32, #tpu.memory_space<vmem>>) attributes {dimension_semantics = [#tpu.dimension_semantics<parallel>], iteration_bounds = array<i64: 2>, scalar_prefetch = 0 : i64, scratch_operands = 0 : i64, tpu.core_type = #tpu.core_type<tc>, window_params = [{transform_indices = @transform_0, window_bounds = array<i64: 8, 8, 32>}, {transform_indices = @transform_1, window_bounds = array<i64: 8, 8, 32>}, {transform_indices = @transform_2, window_bounds = array<i64: 8, 8, 32>}, {transform_indices = @transform_3, window_bounds = array<i64: 8, 8, 32>}, {transform_indices = @transform_4, window_bounds = array<i64: 1, 1, 8>}]} {
    %c0 = arith.constant 0 : index
    %c0_0 = arith.constant 0 : index
    %c0_1 = arith.constant 0 : index
    %0 = vector.load %arg1[%c0, %c0_0, %c0_1] : memref<8x8x32xf32, #tpu.memory_space<vmem>>, vector<8x8x32xf32>
    %c0_2 = arith.constant 0 : index
    %c0_3 = arith.constant 0 : index
    %c0_4 = arith.constant 0 : index
    %1 = vector.load %arg2[%c0_2, %c0_3, %c0_4] : memref<8x8x32xf32, #tpu.memory_space<vmem>>, vector<8x8x32xf32>
    %c0_5 = arith.constant 0 : index
    %c0_6 = arith.constant 0 : index
    %c0_7 = arith.constant 0 : index
    %2 = vector.load %arg3[%c0_5, %c0_6, %c0_7] : memref<8x8x32xf32, #tpu.memory_space<vmem>>, vector<8x8x32xf32>
    %c0_8 = arith.constant 0 : index
    %c0_9 = arith.constant 0 : index
    %c0_10 = arith.constant 0 : index
    %3 = vector.load %arg4[%c0_8, %c0_9, %c0_10] : memref<8x8x32xf32, #tpu.memory_space<vmem>>, vector<8x8x32xf32>
    %cst = arith.constant dense<0.000000e+00> : vector<8x32xf32>
    %4 = vector.multi_reduction <add>, %0, %cst [1] : vector<8x8x32xf32> to vector<8x32xf32>
    %5 = arith.mulf %4, %4 : vector<8x32xf32>
    %cst_11 = arith.constant dense<0.000000e+00> : vector<8xf32>
    %6 = vector.multi_reduction <add>, %5, %cst_11 [1] : vector<8x32xf32> to vector<8xf32>
    %7 = vector.shape_cast %6 : vector<8xf32> to vector<8x1xf32>
    %cst_12 = arith.constant 6.400000e-23 : f32
    %8 = vector.broadcast %cst_12 : f32 to vector<8x1xf32>
    %9 = arith.maximumf %7, %8 : vector<8x1xf32>
    %10 = math.rsqrt %9 : vector<8x1xf32>
    %11 = vector.broadcast %10 : vector<8x1xf32> to vector<8x32xf32>
    %12 = arith.mulf %4, %11 : vector<8x32xf32>
    %cst_13 = arith.constant dense<0.000000e+00> : vector<8x32xf32>
    %13 = vector.multi_reduction <add>, %1, %cst_13 [1] : vector<8x8x32xf32> to vector<8x32xf32>
    %14 = arith.mulf %13, %13 : vector<8x32xf32>
    %cst_14 = arith.constant dense<0.000000e+00> : vector<8xf32>
    %15 = vector.multi_reduction <add>, %14, %cst_14 [1] : vector<8x32xf32> to vector<8xf32>
    %16 = vector.shape_cast %15 : vector<8xf32> to vector<8x1xf32>
    %cst_15 = arith.constant 6.400000e-23 : f32
    %17 = vector.broadcast %cst_15 : f32 to vector<8x1xf32>
    %18 = arith.maximumf %16, %17 : vector<8x1xf32>
    %19 = math.rsqrt %18 : vector<8x1xf32>
    %20 = vector.broadcast %19 : vector<8x1xf32> to vector<8x32xf32>
    %21 = arith.mulf %13, %20 : vector<8x32xf32>
    %cst_16 = arith.constant dense<0.000000e+00> : vector<8x32xf32>
    %22 = vector.multi_reduction <add>, %2, %cst_16 [1] : vector<8x8x32xf32> to vector<8x32xf32>
    %23 = arith.mulf %22, %22 : vector<8x32xf32>
    %cst_17 = arith.constant dense<0.000000e+00> : vector<8xf32>
    %24 = vector.multi_reduction <add>, %23, %cst_17 [1] : vector<8x32xf32> to vector<8xf32>
    %25 = vector.shape_cast %24 : vector<8xf32> to vector<8x1xf32>
    %cst_18 = arith.constant 6.400000e-23 : f32
    %26 = vector.broadcast %cst_18 : f32 to vector<8x1xf32>
    %27 = arith.maximumf %25, %26 : vector<8x1xf32>
    %28 = math.rsqrt %27 : vector<8x1xf32>
    %29 = vector.broadcast %28 : vector<8x1xf32> to vector<8x32xf32>
    %30 = arith.mulf %22, %29 : vector<8x32xf32>
    %cst_19 = arith.constant dense<0.000000e+00> : vector<8x32xf32>
    %31 = vector.multi_reduction <add>, %3, %cst_19 [1] : vector<8x8x32xf32> to vector<8x32xf32>
    %32 = arith.mulf %31, %31 : vector<8x32xf32>
    %cst_20 = arith.constant dense<0.000000e+00> : vector<8xf32>
    %33 = vector.multi_reduction <add>, %32, %cst_20 [1] : vector<8x32xf32> to vector<8xf32>
    %34 = vector.shape_cast %33 : vector<8xf32> to vector<8x1xf32>
    %cst_21 = arith.constant 6.400000e-23 : f32
    %35 = vector.broadcast %cst_21 : f32 to vector<8x1xf32>
    %36 = arith.maximumf %34, %35 : vector<8x1xf32>
    %37 = math.rsqrt %36 : vector<8x1xf32>
    %38 = vector.broadcast %37 : vector<8x1xf32> to vector<8x32xf32>
    %39 = arith.mulf %31, %38 : vector<8x32xf32>
    %40 = arith.mulf %3, %3 : vector<8x8x32xf32>
    %cst_22 = arith.constant dense<0.000000e+00> : vector<8x8xf32>
    %41 = vector.multi_reduction <add>, %40, %cst_22 [2] : vector<8x8x32xf32> to vector<8x8xf32>
    %cst_23 = arith.constant 1.000000e-24 : f32
    %42 = vector.broadcast %cst_23 : f32 to vector<8x8xf32>
    %43 = arith.maximumf %41, %42 : vector<8x8xf32>
    %44 = math.rsqrt %43 : vector<8x8xf32>
    %cst_24 = arith.constant 1.000000e+01 : f32
    %45 = vector.broadcast %cst_24 : f32 to vector<8x8xf32>
    %46 = arith.mulf %44, %45 : vector<8x8xf32>
    %47 = arith.mulf %2, %2 : vector<8x8x32xf32>
    %cst_25 = arith.constant dense<0.000000e+00> : vector<8x8xf32>
    %48 = vector.multi_reduction <add>, %47, %cst_25 [2] : vector<8x8x32xf32> to vector<8x8xf32>
    %cst_26 = arith.constant 1.000000e-24 : f32
    %49 = vector.broadcast %cst_26 : f32 to vector<8x8xf32>
    %50 = arith.maximumf %48, %49 : vector<8x8xf32>
    %51 = math.rsqrt %50 : vector<8x8xf32>
    %cst_27 = arith.constant 1.000000e+01 : f32
    %52 = vector.broadcast %cst_27 : f32 to vector<8x8xf32>
    %53 = arith.mulf %51, %52 : vector<8x8xf32>
    %54 = arith.mulf %12, %30 : vector<8x32xf32>
    %cst_28 = arith.constant dense<0.000000e+00> : vector<8xf32>
    %55 = vector.multi_reduction <add>, %54, %cst_28 [1] : vector<8x32xf32> to vector<8xf32>
    %56 = vector.shape_cast %55 : vector<8xf32> to vector<8x1xf32>
    %cst_29 = arith.constant 1.000000e+01 : f32
    %57 = vector.broadcast %cst_29 : f32 to vector<8x1xf32>
    %58 = arith.mulf %56, %57 : vector<8x1xf32>
    %59 = vector.shape_cast %12 : vector<8x32xf32> to vector<8x1x32xf32>
    %60 = vector.shape_cast %30 : vector<8x32xf32> to vector<8x1x32xf32>
    %61 = tpu.concatenate %59, %60 in 1 : vector<8x1x32xf32>, vector<8x1x32xf32> -> vector<8x2x32xf32>
    "tpu.trace_start"() <{level = 10 : i32, message = "npc,ntc->npt"}> : () -> ()
    %cst_30 = arith.constant dense<0.000000e+00> : vector<8x2x8xf32>
    %62 = tpu.matmul %61, %3, %cst_30 {dimension_numbers = #tpu.dot_dimension_numbers<[2], [2], [1], [1], [0, 0, 0, 1, 1, 1], [0], [0]>} : vector<8x2x32xf32>, vector<8x8x32xf32>, vector<8x2x8xf32> -> vector<8x2x8xf32>
    "tpu.trace_stop"() : () -> ()
    %63 = vector.shape_cast %46 : vector<8x8xf32> to vector<8x1x8xf32>
    %64 = vector.broadcast %63 : vector<8x1x8xf32> to vector<8x2x8xf32>
    %65 = arith.mulf %62, %64 : vector<8x2x8xf32>
    %cst_31 = arith.constant dense<0xFF800000> : vector<8x2xf32>
    %66 = vector.multi_reduction <maximumf>, %65, %cst_31 [2] : vector<8x2x8xf32> to vector<8x2xf32>
    %67 = vector.broadcast %58 : vector<8x1xf32> to vector<8x2xf32>
    %68 = arith.maximumf %67, %66 : vector<8x2xf32>
    %69 = vector.broadcast %58 : vector<8x1xf32> to vector<8x2xf32>
    %70 = arith.subf %69, %68 : vector<8x2xf32>
    %71 = math.exp %70 : vector<8x2xf32>
    %72 = vector.shape_cast %68 : vector<8x2xf32> to vector<8x2x1xf32>
    %73 = vector.broadcast %72 : vector<8x2x1xf32> to vector<8x2x8xf32>
    %74 = arith.subf %65, %73 : vector<8x2x8xf32>
    %75 = math.exp %74 : vector<8x2x8xf32>
    %cst_32 = arith.constant dense<0.000000e+00> : vector<8x2xf32>
    %76 = vector.multi_reduction <add>, %75, %cst_32 [2] : vector<8x2x8xf32> to vector<8x2xf32>
    %77 = arith.addf %71, %76 : vector<8x2xf32>
    %78 = math.log %77 : vector<8x2xf32>
    %79 = arith.addf %68, %78 : vector<8x2xf32>
    %80 = vector.broadcast %58 : vector<8x1xf32> to vector<8x2xf32>
    %81 = arith.subf %79, %80 : vector<8x2xf32>
    %82 = arith.mulf %21, %39 : vector<8x32xf32>
    %cst_33 = arith.constant dense<0.000000e+00> : vector<8xf32>
    %83 = vector.multi_reduction <add>, %82, %cst_33 [1] : vector<8x32xf32> to vector<8xf32>
    %84 = vector.shape_cast %83 : vector<8xf32> to vector<8x1xf32>
    %cst_34 = arith.constant 1.000000e+01 : f32
    %85 = vector.broadcast %cst_34 : f32 to vector<8x1xf32>
    %86 = arith.mulf %84, %85 : vector<8x1xf32>
    %87 = vector.shape_cast %21 : vector<8x32xf32> to vector<8x1x32xf32>
    %88 = vector.shape_cast %39 : vector<8x32xf32> to vector<8x1x32xf32>
    %89 = tpu.concatenate %87, %88 in 1 : vector<8x1x32xf32>, vector<8x1x32xf32> -> vector<8x2x32xf32>
    "tpu.trace_start"() <{level = 10 : i32, message = "npc,ntc->npt"}> : () -> ()
    %cst_35 = arith.constant dense<0.000000e+00> : vector<8x2x8xf32>
    %90 = tpu.matmul %89, %2, %cst_35 {dimension_numbers = #tpu.dot_dimension_numbers<[2], [2], [1], [1], [0, 0, 0, 1, 1, 1], [0], [0]>} : vector<8x2x32xf32>, vector<8x8x32xf32>, vector<8x2x8xf32> -> vector<8x2x8xf32>
    "tpu.trace_stop"() : () -> ()
    %91 = vector.shape_cast %53 : vector<8x8xf32> to vector<8x1x8xf32>
    %92 = vector.broadcast %91 : vector<8x1x8xf32> to vector<8x2x8xf32>
    %93 = arith.mulf %90, %92 : vector<8x2x8xf32>
    %cst_36 = arith.constant dense<0xFF800000> : vector<8x2xf32>
    %94 = vector.multi_reduction <maximumf>, %93, %cst_36 [2] : vector<8x2x8xf32> to vector<8x2xf32>
    %95 = vector.broadcast %86 : vector<8x1xf32> to vector<8x2xf32>
    %96 = arith.maximumf %95, %94 : vector<8x2xf32>
    %97 = vector.broadcast %86 : vector<8x1xf32> to vector<8x2xf32>
    %98 = arith.subf %97, %96 : vector<8x2xf32>
    %99 = math.exp %98 : vector<8x2xf32>
    %100 = vector.shape_cast %96 : vector<8x2xf32> to vector<8x2x1xf32>
    %101 = vector.broadcast %100 : vector<8x2x1xf32> to vector<8x2x8xf32>
    %102 = arith.subf %93, %101 : vector<8x2x8xf32>
    %103 = math.exp %102 : vector<8x2x8xf32>
    %cst_37 = arith.constant dense<0.000000e+00> : vector<8x2xf32>
    %104 = vector.multi_reduction <add>, %103, %cst_37 [2] : vector<8x2x8xf32> to vector<8x2xf32>
    %105 = arith.addf %99, %104 : vector<8x2xf32>
    %106 = math.log %105 : vector<8x2xf32>
    %107 = arith.addf %96, %106 : vector<8x2xf32>
    %108 = vector.broadcast %86 : vector<8x1xf32> to vector<8x2xf32>
    %109 = arith.subf %107, %108 : vector<8x2xf32>
    %110 = arith.addf %81, %109 : vector<8x2xf32>
    %cst_38 = arith.constant dense<0.000000e+00> : vector<8xf32>
    %111 = vector.multi_reduction <add>, %110, %cst_38 [1] : vector<8x2xf32> to vector<8xf32>
    %112 = vector.shape_cast %111 : vector<8xf32> to vector<1x1x8xf32>
    %c0_39 = arith.constant 0 : index
    %c0_40 = arith.constant 0 : index
    %c0_41 = arith.constant 0 : index
    %113 = vector.load %arg5[%c0_39, %c0_40, %c0_41] : memref<1x1x8xf32, #tpu.memory_space<vmem>>, vector<1x1x8xf32>
    tpu.vector_store %arg5[%c0_39, %c0_40, %c0_41], %112 {strides = array<i32>} : memref<1x1x8xf32, #tpu.memory_space<vmem>>, vector<1x1x8xf32>,
    return
  }
  func.func @transform_0(%arg0: i32) -> (i32, i32, i32) {
    %c0_i32 = arith.constant 0 : i32
    %c0_i32_0 = arith.constant 0 : i32
    %c0_i32_1 = arith.constant 0 : i32
    return %arg0, %c0_i32, %c0_i32_0 : i32, i32, i32
  }
  func.func @transform_1(%arg0: i32) -> (i32, i32, i32) {
    %c0_i32 = arith.constant 0 : i32
    %c0_i32_0 = arith.constant 0 : i32
    %c0_i32_1 = arith.constant 0 : i32
    return %arg0, %c0_i32, %c0_i32_0 : i32, i32, i32
  }
  func.func @transform_2(%arg0: i32) -> (i32, i32, i32) {
    %c0_i32 = arith.constant 0 : i32
    %c0_i32_0 = arith.constant 0 : i32
    %c0_i32_1 = arith.constant 0 : i32
    return %arg0, %c0_i32, %c0_i32_0 : i32, i32, i32
  }
  func.func @transform_3(%arg0: i32) -> (i32, i32, i32) {
    %c0_i32 = arith.constant 0 : i32
    %c0_i32_0 = arith.constant 0 : i32
    %c0_i32_1 = arith.constant 0 : i32
    return %arg0, %c0_i32, %c0_i32_0 : i32, i32, i32
  }
  func.func @transform_4(%arg0: i32) -> (i32, i32, i32) {
    %c0_i32 = arith.constant 0 : i32
    %c0_i32_0 = arith.constant 0 : i32
    %c0_i32_1 = arith.constant 0 : i32
    return %arg0, %c0_i32, %c0_i32_0 : i32, i32, i32
  }
}

</mosaic_0001>

<bundles_post_ra>
// kernel: tpu_custom_call.1
= control target key start
LH: loop header
LB: loop body
LE: loop exit
PB: predicated region body
PF: predicated region fallthrough
CT: control target
= control target key end

     0   :  { %s4589_s0 = inlined_call_operand.hbm [shape: f32[16,8,32], index: 0, kind: input, shape index: {}]   ;;  %s4590_s1 = inlined_call_operand.hbm [shape: f32[16,8,32], index: 1, kind: input, shape index: {}]   ;;  %s4591_s2 = inlined_call_operand.hbm [shape: f32[16,8,32], index: 2, kind: input, shape index: {}]   ;;  %s4592_s3 = inlined_call_operand.hbm [shape: f32[16,8,32], index: 3, kind: input, shape index: {}]   ;;  %s4593_s4 = inlined_call_operand.hbm [shape: f32[2,1,8], index: 4, kind: output, shape index: {}]  }
   0x1   :  { %4604 = sst [smem:[#allocation20_spill]] %s4589_s0 }
   0x2   :  { %4605 = sst [smem:[#allocation21_spill]] %s4590_s1 }
   0x3   :  { %9 = vsyncpa [#allocation3], 0 }
   0x4   :  { %11 = vsyncpa [#allocation3 + $0x1], 0 }
   0x5   :  { %12 = vsyncpa [#allocation6], 0 }
   0x6   :  { %14 = vsyncpa [#allocation6 + $0x1], 0 }
   0x7   :  { %15 = vsyncpa [#allocation9], 0 }
   0x8   :  { %17 = vsyncpa [#allocation9 + $0x1], 0 }
   0x9   :  { %18 = vsyncpa [#allocation4], 0 }
   0xa   :  { %20 = vsyncpa [#allocation4 + $0x1], 0  ;;  %s3566_s15 = smov 0   ;;  %s3568_s16 = smov 0  }
   0xb   :  { %s3570_s17 = smov 0   ;;  %s3572_s18 = smov 0  }
   0xc LB: > { %s3587_s19 = sadd.s32 4294967295, %s3530_s18   ;;  %s3014_s20 = sadd.s32 4294967294, %s3530_s18   ;;  %s3530_s18 = sphi %s3572_s18, %s4635_s18   ;;  %s3526_s17 = sphi %s3570_s17, %s4634_s17   ;;  %s3522_s16 = sphi %s3568_s16, %s4633_s16   ;;  %s3518_s15 = sphi %s3566_s15, %s4632_s15  }
   0xd   : > { %s3591_s21 = sadd.s32 1, %s3530_s18   ;;  %s33_s22 = sadd.s32 1, %s3526_s17 }
   0xe   : > { %s30_s23 = ssub.s32 %s3530_s18, %s3591_s21  ;;  %p40_p0 = scmp.ne.s32.totalorder %s3526_s17, %s3522_s16 }
   0xf   : > { %p31_p1 = scmp.eq.s32.totalorder %s30_s23, 0  ;;  %p41_p2 = scmp.eq.s32.totalorder %s3530_s18, 0 }
  0x10   : > { %p46_p3 = scmp.ne.s32.totalorder %s3522_s16, %s3518_s15  ;;  %p47_p4 = scmp.eq.s32.totalorder %s3587_s19, 0 }
  0x11   : > { %s3603_s24 = scalar_select %p31_p1, %s3526_s17, %s33_s22  }
  0x12   : > { %p42_p5 = por %p41_p2, %p40_p0  ;;  %p3605_p6 = por %p47_p4, %p46_p3 }
  0x13   : > { %4606 = sst [smem:[#allocation15_spill]] %s3603_s24  ;;  %p148_p7 = scmp.eq.s32.totalorder %s3587_s19, 1 }
  0x14   : > { %s4607_s25 = scalar_select %p3605_p6, 1, 0 }
  0x15   : > { %p154_p8 = scmp.eq.s32.totalorder %s3014_s20, 1  ;;  %p3212_p10 = scmp.lt.s32.totalorder %s3530_s18, 2 }
  0x16   : > { %p3612_p11 = por %p148_p7, %p40_p0  ;;  %s3621_s28 = sand.u32 1, %s3526_s17  }
  0x17   : > { %p3616_p12 = por %p154_p8, %p46_p3  ;;  %s3624_s29 = sshll.u32 %s3530_s18, 10 }
  0x18   : > { %s4608_s26 = scalar_select %p3612_p11, 1, 0 }
  0x19   : > { %s4609_s27 = scalar_select %p3616_p12, 1, 0 }
  0x1a   : > { %s3627_s30 = sshll.u32 %s3621_s28, 6  ;;  %p3629_p13 = pnand %p3212_p10, %p42_p5 }
  0x1b   : > { %s195_s6 = sand.u32 1, %s3530_s18   ;;  %s4611_s1 = sld [smem:[#allocation21_spill]] }
  0x1c   : > { %s199_s10 = scalar_lea.vmem [#allocation5], %s3627_s30  ;;  %s3644_s12 = scalar_lea.sflag [#allocation6], %s195_s6 }
  0x1d   : > { %s206_s11 = sshll.u32 %s199_s10, 4  ;;  %p3650_p2 = pneg %p3629_p13  ;;  %s3641_s11 = int_to_ptr.vmem [resolvable:$true] %s206_s11 }
  0x21   : > { %s3638_s9 = scalar_lea.hbm %s4611_s1, %s3624_s29  ;;  %s3341_s23 = scalar_lea.hbm %s4611_s1, 2048 }
  0x22   : > { %s3336_s13 = scalar_lea.hbm %s3638_s9, 1024  ;;  %p3342_p5 = scmp.lt.u32.totalorder %s3638_s9, %s4611_s1 }
  0x23   : > { %p3337_p1 = scmp.ne.s32.totalorder %s3638_s9, %s3336_s13  ;;  %p3343_p7 = scmp.lt.u32.totalorder %s3341_s23, %s3336_s13 }
  0x24   : > { %p3345_p10 = scmp.lt.u32.totalorder %s3336_s13, %s3638_s9 }
  0x25   : > { %p3339_p3 = pnand %p3650_p2, %p3337_p1  ;;  %p3344_p8 = por %p3343_p7, %p3342_p5 }
  0x27   : > { %p3340_p4 = pneg %p3339_p3  ;;  %p3346_p9 = por %p3345_p10, %p3344_p8 }
  0x29   : > { %p3347_p0 = pnand %p3346_p9, %p3340_p4 }
  0x2b   : > { %3350 = shalt.err (!%p3347_p0)
}
  0x2c   : > { %s3351_s6 = scalar_lea.vmem %s3641_s11, 1024  ;;  %s3532_s10 = smov [#allocation5]  }
  0x2d   : > { %p3352_p1 = scmp.ne.s32.totalorder %s3641_s11, %s3351_s6  ;;  %s3356_s20 = sshll.u32 %s3532_s10, 4  ;;  %s3357_s20 = int_to_ptr.vmem [resolvable:$false] %s3356_s20 }
  0x2e   : > { %s3358_s22 = scalar_lea.vmem %s3357_s20, 2048  ;;  %p3359_p11 = scmp.lt.s32.totalorder %s3641_s11, %s3357_s20 }
  0x2f   : > { %p3354_p3 = pnand %p3352_p1, %p3650_p2  ;;  %p3360_p6 = scmp.lt.s32.totalorder %s3358_s22, %s3351_s6 }
  0x31   : > { %p3355_p12 = pneg %p3354_p3  ;;  %p3361_p5 = por %p3360_p6, %p3359_p11 }
  0x33   : > { %p3362_p7 = pnand %p3361_p5, %p3355_p12 }
  0x35   : > { %3365 = shalt.err (!%p3362_p7)
}
  0x36   : > { %s4596_s13 = smov 128   ;;  %s4598_s23 = smov 8  }
  0x37   : > { %3201 = dma.hbm_to_vmem [thread:$0]  (!%p3629_p13), %s3638_s9, 1024, %s3641_s11, %s3644_s12, %s4596_s13, %s4596_s13, %s4598_s23  }
  0x38   : > { %p256_p6 = scmp.lt.s32.totalorder %s3530_s18, 3  ;;  %s4613_s0 = sld [smem:[#allocation20_spill]] }
  0x39   : > { %p4614_p9 = scmp.ge.s32.totalorder %s3530_s18, 1  ;;  %s178_s20 = scalar_lea.vmem [#allocation2], %s3627_s30 }
  0x3a   : > { %s185_s22 = sshll.u32 %s178_s20, 4  ;;  %s175_s9 = scalar_lea.sflag [#allocation3], %s3621_s28  ;;  %s3691_s22 = int_to_ptr.vmem [resolvable:$true] %s185_s22 }
  0x3b   : > { %p3686_p11 = pnand %p4614_p9, %p256_p6 }
  0x3d   : > { %s4615_s10 = scalar_select %p3686_p11, 1, 0 }
  0x3e   : > { %s3682_s6 = scalar_lea.hbm %s4613_s0, %s3624_s29  ;;  %s3371_s13 = scalar_lea.hbm %s4613_s0, 2048 }
  0x3f   : > { %s3366_s11 = scalar_lea.hbm %s3682_s6, 1024  ;;  %p3372_p8 = scmp.lt.u32.totalorder %s3682_s6, %s4613_s0 }
  0x40   : > { %p3367_p12 = scmp.ne.s32.totalorder %s3682_s6, %s3366_s11  ;;  %p3373_p10 = scmp.lt.u32.totalorder %s3371_s13, %s3366_s11 }
  0x41   : > { %p3375_p3 = scmp.lt.u32.totalorder %s3366_s11, %s3682_s6 }
  0x42   : > { %p3369_p0 = pnand %p3367_p12, %p3650_p2  ;;  %p3374_p1 = por %p3373_p10, %p3372_p8 }
  0x44   : > { %p3370_p4 = pneg %p3369_p0  ;;  %p3376_p5 = por %p3375_p3, %p3374_p1 }
  0x46   : > { %p3377_p7 = pnand %p3376_p5, %p3370_p4 }
  0x48   : > { %3380 = shalt.err (!%p3377_p7)
}
  0x49   : > { %s3381_s20 = scalar_lea.vmem %s3691_s22, 1024  ;;  %s3535_s7 = smov [#allocation2]  }
  0x4a   : > { %p3382_p6 = scmp.ne.s32.totalorder %s3691_s22, %s3381_s20  ;;  %s3386_s8 = sshll.u32 %s3535_s7, 4  ;;  %s3387_s8 = int_to_ptr.vmem [resolvable:$false] %s3386_s8 }
  0x4b   : > { %s3388_s1 = scalar_lea.vmem %s3387_s8, 2048  ;;  %p3389_p0 = scmp.lt.s32.totalorder %s3691_s22, %s3387_s8 }
  0x4c   : > { %p3384_p9 = pnand %p3382_p6, %p3650_p2  ;;  %p3390_p11 = scmp.lt.s32.totalorder %s3388_s1, %s3381_s20 }
  0x4e   : > { %p3385_p12 = pneg %p3384_p9  ;;  %p3391_p8 = por %p3390_p11, %p3389_p0 }
  0x50   : > { %p3392_p10 = pnand %p3391_p8, %p3385_p12 }
  0x52   : > { %3395 = shalt.err (!%p3392_p10)
}
  0x53   : > { %s4616_s13 = smov 8   ;;  %s4617_s23 = smov 128  }
  0x54   : > { %3198 = dma.hbm_to_vmem [thread:$0]  (!%p3629_p13), %s3682_s6, 1024, %s3691_s22, %s175_s9, %s4617_s23, %s4617_s23, %s4616_s13  }
  0x55   : > { %s3724_s20 = scalar_lea.hbm %s4591_s2, %s3624_s29  ;;  %s220_s8 = scalar_lea.vmem [#allocation7], %s3627_s30 }
  0x56   : > { %s227_s1 = sshll.u32 %s220_s8, 4  ;;  %s3396_s0 = scalar_lea.hbm %s3724_s20, 1024  ;;  %s3727_s1 = int_to_ptr.vmem [resolvable:$true] %s227_s1 }
  0x57   : > { %p3397_p11 = scmp.ne.s32.totalorder %s3724_s20, %s3396_s0  ;;  %s3401_s22 = scalar_lea.hbm %s4591_s2, 2048 }
  0x58   : > { %p3402_p3 = scmp.lt.u32.totalorder %s3724_s20, %s4591_s2  ;;  %p3403_p5 = scmp.lt.u32.totalorder %s3401_s22, %s3396_s0 }
  0x59   : > { %p3399_p4 = pnand %p3397_p11, %p3650_p2  ;;  %p3405_p6 = scmp.lt.u32.totalorder %s3396_s0, %s3724_s20 }
  0x5a   : > { %p3404_p7 = por %p3403_p5, %p3402_p3 }
  0x5b   : > { %p3400_p1 = pneg %p3399_p4 }
  0x5c   : > { %p3406_p9 = por %p3405_p6, %p3404_p7 }
  0x5e   : > { %p3407_p12 = pnand %p3406_p9, %p3400_p1 }
  0x60   : > { %3410 = shalt.err (!%p3407_p12)
}
  0x61   : > { %s3411_s7 = scalar_lea.vmem %s3727_s1, 1024  ;;  %s3536_s24 = smov [#allocation7]  }
  0x62   : > { %p3412_p0 = scmp.ne.s32.totalorder %s3727_s1, %s3411_s7  ;;  %s3416_s8 = sshll.u32 %s3536_s24, 4  ;;  %s3417_s8 = int_to_ptr.vmem [resolvable:$false] %s3416_s8 }
  0x63   : > { %s3418_s6 = scalar_lea.vmem %s3417_s8, 2048  ;;  %p3419_p11 = scmp.lt.s32.totalorder %s3727_s1, %s3417_s8 }
  0x64   : > { %p3414_p8 = pnand %p3412_p0, %p3650_p2  ;;  %p3420_p4 = scmp.lt.s32.totalorder %s3418_s6, %s3411_s7 }
  0x66   : > { %p3415_p10 = pneg %p3414_p8  ;;  %p3421_p3 = por %p3420_p4, %p3419_p11 }
  0x68   : > { %p3422_p5 = pnand %p3421_p3, %p3415_p10 }
  0x6a   : > { %3425 = shalt.err (!%p3422_p5)
}
  0x6b   : > { %3204 = dma.hbm_to_vmem [thread:$0]  (!%p3629_p13), %s3724_s20, 1024, %s3727_s1, %s3644_s12, %s4617_s23, %s4617_s23, %s4616_s13  }
  0x6c   : > { %s3758_s9 = scalar_lea.hbm %s4592_s3, %s3624_s29  ;;  %s241_s11 = scalar_lea.vmem [#allocation8], %s3627_s30 }
  0x6d   : > { %s248_s7 = sshll.u32 %s241_s11, 4  ;;  %s238_s24 = scalar_lea.sflag [#allocation9], %s3621_s28  ;;  %s3761_s7 = int_to_ptr.vmem [resolvable:$true] %s248_s7 }
  0x6e   : > { %s3426_s8 = scalar_lea.hbm %s3758_s9, 1024  ;;  %s3431_s1 = scalar_lea.hbm %s4592_s3, 2048 }
  0x6f   : > { %p3427_p1 = scmp.ne.s32.totalorder %s3758_s9, %s3426_s8  ;;  %p3432_p9 = scmp.lt.u32.totalorder %s3758_s9, %s4592_s3 }
  0x70   : > { %p3433_p12 = scmp.lt.u32.totalorder %s3431_s1, %s3426_s8  ;;  %p3435_p8 = scmp.lt.u32.totalorder %s3426_s8, %s3758_s9 }
  0x71   : > { %p3429_p7 = pnand %p3427_p1, %p3650_p2 }
  0x72   : > { %p3434_p0 = por %p3433_p12, %p3432_p9 }
  0x73   : > { %p3430_p6 = pneg %p3429_p7 }
  0x74   : > { %p3436_p10 = por %p3435_p8, %p3434_p0 }
  0x76   : > { %p3437_p11 = pnand %p3436_p10, %p3430_p6 }
  0x78   : > { %3440 = shalt.err (!%p3437_p11)
}
  0x79   : > { %s3441_s30 = scalar_lea.vmem %s3761_s7, 1024  ;;  %s3537_s0 = smov [#allocation8]  }
  0x7a   : > { %p3442_p4 = scmp.ne.s32.totalorder %s3761_s7, %s3441_s30  ;;  %s3446_s22 = sshll.u32 %s3537_s0, 4  ;;  %s3447_s22 = int_to_ptr.vmem [resolvable:$false] %s3446_s22 }
  0x7b   : > { %s3448_s11 = scalar_lea.vmem %s3447_s22, 2048  ;;  %p3449_p1 = scmp.lt.s32.totalorder %s3761_s7, %s3447_s22 }
  0x7c   : > { %p3444_p3 = pnand %p3442_p4, %p3650_p2  ;;  %p3450_p7 = scmp.lt.s32.totalorder %s3448_s11, %s3441_s30 }
  0x7e   : > { %p3445_p5 = pneg %p3444_p3  ;;  %p3451_p9 = por %p3450_p7, %p3449_p1 }
  0x80   : > { %p3452_p12 = pnand %p3451_p9, %p3445_p5 }
  0x82   : > { %3455 = shalt.err (!%p3452_p12)
}
  0x83   : > { %3207 = dma.hbm_to_vmem [thread:$0]  (!%p3629_p13), %s3758_s9, 1024, %s3761_s7, %s238_s24, %s4617_s23, %s4617_s23, %s4616_s13  }
  0x84   : > { %p4618_p2 = scmp.ne.s32.totalorder %s4615_s10, 0 }
  0x86   : > { %260 = sbr.rel (%p4618_p2) target bundleno = 1268 (0x4f4), region = 36 }
  0x8d   : > { %s3793_s14 = sand.u32 1, %s3522_s16   ;;  %p4619_p6 = scmp.ne.s32.totalorder %s4607_s25, 0 }
  0x8e   : > { %s3030_s8 = sshll.u32 %s3793_s14, 6  ;;  %s263_s12 = scalar_lea.sflag [#allocation3], %s3793_s14 }
  0x8f   : > { %s3797_s5 = scalar_lea.vmem [#allocation2], %s3030_s8 }
  0x90   : > { %3501 = dma.done.wait (%p4619_p6), %s263_s12, 1024  }
  0x91   : > { %3503 = vsyncadd (%p4619_p6), %s263_s12, 4294966272  ;;  %s271_s28 = sand.u32 1, %s3587_s19   ;;  %s3804_s13 = scalar_lea.vmem [#allocation5], %s3030_s8 }
  0x92   : > { %s272_s10 = scalar_lea.sflag [#allocation6], %s271_s28 }
  0x93   : > { %3505 = dma.done.wait (%p4619_p6), %s272_s10, 2048  }
  0x94   : > { %3507 = vsyncadd (%p4619_p6), %s272_s10, 4294965248  ;;  %s3810_s23 = scalar_lea.vmem [#allocation7], %s3030_s8  ;;  %s290_s9 = scalar_lea.sflag [#allocation9], %s3793_s14 }
  0x95   : > { %s3813_s7 = scalar_lea.vmem [#allocation8], %s3030_s8 }
  0x96   : > { %3509 = dma.done.wait (%p4619_p6), %s290_s9, 1024  }
  0x97   : > { %3511 = vsyncadd (%p4619_p6), %s290_s9, 4294966272  ;;  %vm368_vm0 = vcmask 261120   ;;  %v3820_v0 = vld [vmem:[%s3810_s23] sm:$0xff]  ;;  %v3823_v1 = vld [vmem:[%s3810_s23 + $0x8] sm:$0xff]  ;;  %vm441_vm1 = vcmask 1041409   ;;  %vm443_vm2 = vcmask 1042434  }
  0x98   : > { %v3826_v2 = vld [vmem:[%s3810_s23 + $0x10] sm:$0xff]  ;;  %v3829_v3 = vld [vmem:[%s3810_s23 + $0x18] sm:$0xff]  ;;  %v3832_v4 = vld [vmem:[%s3810_s23 + $0x20] sm:$0xff]  ;;  %v594_v6 = vsel %vm368_vm0, %v3820_v0, 0.0  ;;  %v601_v7 = vsel %vm368_vm0, %v3823_v1, 0.0  ;;  %vm445_vm3 = vcmask 1043459  }
  0x99   : > { %v3835_v5 = vld [vmem:[%s3810_s23 + $0x28] sm:$0xff]  ;;  %v608_v8 = vsel %vm368_vm0, %v3826_v2, 0.0  ;;  %v3844_v9 = vld [vmem:[%s3810_s23 + $0x30] sm:$0xff]  ;;  %v3847_v10 = vld [vmem:[%s3810_s23 + $0x38] sm:$0xff]  ;;  %v595_v11 = vrot.slane %v594_v6, 4  ;;  %v602_v12 = vrot.slane %v601_v7, 4 }
  0x9a   : > { %v609_v13 = vrot.slane %v608_v8, 4  ;;  %v615_v14 = vsel %vm368_vm0, %v3829_v3, 0.0  ;;  %v622_v16 = vsel %vm368_vm0, %v3832_v4, 0.0  ;;  %v629_v17 = vsel %vm368_vm0, %v3835_v5, 0.0  ;;  %v336_v59 = vld [vmem:[%s3797_s5] sm:$0xff]  ;;  %v337_v60 = vld [vmem:[%s3797_s5 + $0x8] sm:$0xff] }
  0x9b   : > { %v616_v15 = vrot.slane %v615_v14, 4  ;;  %v636_v18 = vsel %vm368_vm0, %v3844_v9, 0.0  ;;  %v596_v19 = vadd.f32 %v595_v11, %v594_v6  ;;  %v603_v20 = vadd.f32 %v602_v12, %v601_v7  ;;  %s3066_s25 = sshll.u32 %s3587_s19, 4  ;;  %s331_s24 = scalar_lea.vmem [#allocation10], %s3793_s14 }
  0x9c   : > { %v610_v21 = vadd.f32 %v609_v13, %v608_v8  ;;  %v623_v22 = vrot.slane %v622_v16, 4  ;;  %v630_v24 = vrot.slane %v629_v17, 4  ;;  %v637_v25 = vrot.slane %v636_v18, 4  ;;  %v338_v13 = vld [vmem:[%s3797_s5 + $0x10] sm:$0xff]  ;;  %s2882_s20 = sshll.u32 %s331_s24, 4  ;;  %s4545_s6 = scalar_lea.hbm %s4593_s4, %s3066_s25  ;;  %s4547_s20 = int_to_ptr.vmem [resolvable:$true] %s2882_s20 }
  0x9d   : > { %v617_v23 = vadd.f32 %v616_v15, %v615_v14  ;;  %v643_v26 = vsel %vm368_vm0, %v3847_v10, 0.0  ;;  %v597_v27 = vrot.slane %v596_v19, 2  ;;  %v604_v28 = vrot.slane %v603_v20, 2  ;;  %s2870_s30 = scalar_lea.sflag [#allocation4], %s3793_s14  ;;  %s3456_s0 = scalar_lea.vmem %s4547_s20, 16 }
  0x9e   : > { %v611_v29 = vrot.slane %v610_v21, 2  ;;  %v624_v30 = vadd.f32 %v623_v22, %v622_v16  ;;  %v631_v32 = vadd.f32 %v630_v24, %v629_v17  ;;  %v638_v33 = vadd.f32 %v637_v25, %v636_v18  ;;  %v339_v16 = vld [vmem:[%s3797_s5 + $0x18] sm:$0xff]  ;;  %v340_v24 = vld [vmem:[%s3797_s5 + $0x20] sm:$0xff]  ;;  %v341_v25 = vld [vmem:[%s3797_s5 + $0x28] sm:$0xff]  ;;  %p3457_p13 = scmp.ne.s32.totalorder %s4547_s20, %s3456_s0  ;;  %p4628_p0 = scmp.ne.s32.totalorder %s4608_s26, 0 }
  0x9f   : > { %v618_v31 = vrot.slane %v617_v23, 2  ;;  %v644_v34 = vrot.slane %v643_v26, 4  ;;  %vm447_vm4 = vcmask 1044484   ;;  %v598_v35 = vadd.f32 %v597_v27, %v596_v19  ;;  %s3540_s19 = smov [#allocation10]  }
  0xa0   : > { %v605_v36 = vadd.f32 %v604_v28, %v603_v20  ;;  %v612_v37 = vadd.f32 %v611_v29, %v610_v21  ;;  %v625_v38 = vrot.slane %v624_v30, 2  ;;  %vm449_vm5 = vcmask 1045509   ;;  %p3458_p8 = pnand %p3457_p13, %p4628_p0  ;;  %s3460_s22 = sshll.u32 %s3540_s19, 4  ;;  %s3461_s22 = int_to_ptr.vmem [resolvable:$false] %s3460_s22 }
  0xa1   : > { %v619_v39 = vadd.f32 %v618_v31, %v617_v23  ;;  %v632_v40 = vrot.slane %v631_v32, 2  ;;  %v639_v41 = vrot.slane %v638_v33, 2  ;;  %v645_v42 = vadd.f32 %v644_v34, %v643_v26  ;;  %s3462_s11 = scalar_lea.vmem %s3461_s22, 32  ;;  %p3463_p11 = scmp.lt.s32.totalorder %s4547_s20, %s3461_s22 }
  0xa2   : > { %vm451_vm6 = vcmask 1046534   ;;  %v599_v43 = vrot.slane %v598_v35, 1  ;;  %v606_v44 = vrot.slane %v605_v36, 1  ;;  %v613_v45 = vrot.slane %v612_v37, 1  ;;  %p3459_p10 = pneg %p3458_p8  ;;  %p3464_p4 = scmp.lt.s32.totalorder %s3462_s11, %s3456_s0 }
  0xa3   : > { %v626_v46 = vadd.f32 %v625_v38, %v624_v30  ;;  %vm453_vm7 = vcmask 1047559   ;;  %v620_v47 = vrot.slane %v619_v39, 1  ;;  %v633_v48 = vadd.f32 %v632_v40, %v631_v32  ;;  %v342_v38 = vld [vmem:[%s3797_s5 + $0x30] sm:$0xff] }
  0xa4   : > { %v640_v49 = vadd.f32 %v639_v41, %v638_v33  ;;  %v646_v50 = vrot.slane %v645_v42, 2  ;;  %v3859_v51 = vadd.f32 %v599_v43, %v598_v35  ;;  %v3861_v52 = vadd.f32 %v606_v44, %v605_v36  ;;  %p3465_p3 = por %p3464_p4, %p3463_p11 }
  0xa5   : > { %v3863_v53 = vadd.f32 %v613_v45, %v612_v37  ;;  %v627_v54 = vrot.slane %v626_v46, 1  ;;  %v3865_v55 = vadd.f32 %v620_v47, %v619_v39  ;;  %v634_v56 = vrot.slane %v633_v48, 1  ;;  %v343_v47 = vld [vmem:[%s3797_s5 + $0x38] sm:$0xff] }
  0xa6   : > { %v641_v57 = vrot.slane %v640_v49, 1  ;;  %v647_v58 = vadd.f32 %v646_v50, %v645_v42  ;;  %v650_v62 = vmul.f32 %v3859_v51, %v3859_v51  ;;  %v651_v63 = vmul.f32 %v3861_v52, %v3861_v52  ;;  %p3466_p5 = pnand %p3465_p3, %p3459_p10 }
  0xa7   : > { %v3869_v61 = vadd.f32 %v627_v54, %v626_v46  ;;  %v652_v6 = vmul.f32 %v3863_v53, %v3863_v53  ;;  %v3877_v7 = vadd.f32 %v634_v56, %v633_v48  ;;  %v653_v12 = vmul.f32 %v3865_v55, %v3865_v55 }
  0xa8   : > { %v3879_v8 = vadd.f32 %v641_v57, %v640_v49  ;;  %v648_v11 = vrot.slane %v647_v58, 1  ;;  %v666_v15 = vsel %vm441_vm1, %v651_v63, %v650_v62  ;;  %v369_v17 = vsel %vm368_vm0, %v336_v59, 0.0 }
  0xa9   : > { %v654_v14 = vmul.f32 %v3869_v61, %v3869_v61  ;;  %v376_v18 = vsel %vm368_vm0, %v337_v60, 0.0  ;;  %v655_v20 = vmul.f32 %v3877_v7, %v3877_v7  ;;  %v667_v22 = vsel %vm443_vm2, %v652_v6, %v666_v15 }
  0xaa   : > { %v3890_v19 = vadd.f32 %v648_v11, %v647_v58  ;;  %v656_v21 = vmul.f32 %v3879_v8, %v3879_v8  ;;  %v668_v23 = vsel %vm445_vm3, %v653_v12, %v667_v22  ;;  %v370_v26 = vrot.slane %v369_v17, 4 }
  0xab   : > { %v377_v27 = vrot.slane %v376_v18, 4  ;;  %v383_v28 = vsel %vm368_vm0, %v338_v13, 0.0  ;;  %v669_v30 = vsel %vm447_vm4, %v654_v14, %v668_v23  ;;  %v390_v32 = vsel %vm368_vm0, %v339_v16, 0.0 }
  0xac   : > { %v657_v29 = vmul.f32 %v3890_v19, %v3890_v19  ;;  %v384_v31 = vrot.slane %v383_v28, 4  ;;  %v670_v33 = vsel %vm449_vm5, %v655_v20, %v669_v30  ;;  %v371_v34 = vadd.f32 %v370_v26, %v369_v17 }
  0xad   : > { %v378_v35 = vadd.f32 %v377_v27, %v376_v18  ;;  %v391_v36 = vrot.slane %v390_v32, 4  ;;  %v671_v37 = vsel %vm451_vm6, %v656_v21, %v670_v33  ;;  %v397_v40 = vsel %vm368_vm0, %v340_v24, 0.0  ;;  %v3922_v27 = vld [vmem:[%s3813_s7] sm:$0xff] }
  0xae   : > { %v385_v39 = vadd.f32 %v384_v31, %v383_v28  ;;  %v404_v41 = vsel %vm368_vm0, %v341_v25, 0.0  ;;  %v672_v42 = vsel %vm453_vm7, %v657_v29, %v671_v37  ;;  %v372_v43 = vrot.slane %v371_v34, 2 }
  0xaf   : > { %v379_v44 = vrot.slane %v378_v35, 2  ;;  %v392_v45 = vadd.f32 %v391_v36, %v390_v32  ;;  %v674_v46 = vsel %vm368_vm0, %v672_v42, 0.0  ;;  %v398_v49 = vrot.slane %v397_v40, 4  ;;  %v3933_v36 = vld [vmem:[%s3813_s7 + $0x8] sm:$0xff] }
  0xb0   : > { %v386_v48 = vrot.slane %v385_v39, 2  ;;  %v405_v50 = vrot.slane %v404_v41, 4  ;;  %675 = vadd.xlane.f32.xlu0 %v674_v46  ;;  %v373_v54 = vadd.f32 %v372_v43, %v371_v34  ;;  %v411_v58 = vsel %vm368_vm0, %v342_v38, 0.0  ;;  %v3949_v46 = vld [vmem:[%s3813_s7 + $0x18] sm:$0xff] }
  0xb1   : > { %v380_v56 = vadd.f32 %v379_v44, %v378_v35  ;;  %v393_v57 = vrot.slane %v392_v45, 2  ;;  %v399_v60 = vadd.f32 %v398_v49, %v397_v40  ;;  %v412_v63 = vrot.slane %v411_v58, 4 }
  0xb2   : > { %v387_v59 = vadd.f32 %v386_v48, %v385_v39  ;;  %v406_v62 = vadd.f32 %v405_v50, %v404_v41  ;;  %v374_v6 = vrot.slane %v373_v54, 1  ;;  %v418_v13 = vsel %vm368_vm0, %v343_v47, 0.0 }
  0xb3   : > { %v381_v11 = vrot.slane %v380_v56, 1  ;;  %v394_v12 = vadd.f32 %v393_v57, %v392_v45  ;;  %v400_v15 = vrot.slane %v399_v60, 2  ;;  %v413_v17 = vadd.f32 %v412_v63, %v411_v58  ;;  %v3946_v45 = vld [vmem:[%s3813_s7 + $0x10] sm:$0xff] }
  0xb4   : > { %v388_v14 = vrot.slane %v387_v59, 1  ;;  %v407_v16 = vrot.slane %v406_v62, 2  ;;  %v3915_v18 = vadd.f32 %v374_v6, %v373_v54  ;;  %v419_v22 = vrot.slane %v418_v13, 4 }
  0xb5   : > { %v3917_v20 = vadd.f32 %v381_v11, %v380_v56  ;;  %v395_v21 = vrot.slane %v394_v12, 1  ;;  %v401_v24 = vadd.f32 %v400_v15, %v399_v60  ;;  %v414_v26 = vrot.slane %v413_v17, 2  ;;  %v3961_v60 = vld [vmem:[%s3813_s7 + $0x20] sm:$0xff] }
  0xb6   : > { %v3919_v23 = vadd.f32 %v388_v14, %v387_v59  ;;  %v408_v25 = vadd.f32 %v407_v16, %v406_v62  ;;  %v420_v29 = vadd.f32 %v419_v22, %v418_v13  ;;  %v425_v30 = vmul.f32 %v3915_v18, %v3915_v18 }
  0xb7   : > { %v3924_v28 = vadd.f32 %v395_v21, %v394_v12  ;;  %v426_v31 = vmul.f32 %v3917_v20, %v3917_v20  ;;  %v402_v32 = vrot.slane %v401_v24, 1  ;;  %v415_v34 = vadd.f32 %v414_v26, %v413_v17  ;;  %v3974_v17 = vld [vmem:[%s3813_s7 + $0x28] sm:$0xff]  ;;  %v3977_v21 = vld [vmem:[%s3813_s7 + $0x30] sm:$0xff] }
  0xb8   : > { %v409_v33 = vrot.slane %v408_v25, 1  ;;  %v427_v35 = vmul.f32 %v3919_v23, %v3919_v23  ;;  %v421_v37 = vrot.slane %v420_v29, 2  ;;  %v703_v40 = vsel %vm368_vm0, %v3922_v27, 0.0 }
  0xb9   : > { %v428_v38 = vmul.f32 %v3924_v28, %v3924_v28  ;;  %v442_v39 = vsel %vm441_vm1, %v426_v31, %v425_v30  ;;  %v3940_v41 = vadd.f32 %v402_v32, %v401_v24  ;;  %v416_v43 = vrot.slane %v415_v34, 1 }
  0xba   : > { %v3942_v42 = vadd.f32 %v409_v33, %v408_v25  ;;  %v444_v44 = vsel %vm443_vm2, %v427_v35, %v442_v39  ;;  %v422_v47 = vadd.f32 %v421_v37, %v420_v29  ;;  %v704_v49 = vrot.slane %v703_v40, 4 }
  0xbb   : > { %v446_v48 = vsel %vm445_vm3, %v428_v38, %v444_v44  ;;  %v710_v50 = vsel %vm368_vm0, %v3933_v36, 0.0  ;;  %v3954_v54 = vadd.f32 %v416_v43, %v415_v34  ;;  %v429_v56 = vmul.f32 %v3940_v41, %v3940_v41  ;;  %v3990_v43 = vld [vmem:[%s3813_s7 + $0x38] sm:$0xff] }
  0xbc   : > { %v430_v57 = vmul.f32 %v3942_v42, %v3942_v42  ;;  %v711_v58 = vrot.slane %v710_v50, 4  ;;  %v423_v59 = vrot.slane %v422_v47, 1  ;;  %v705_v62 = vadd.f32 %v704_v49, %v703_v40 }
  0xbd   : > { %v717_v63 = vsel %vm368_vm0, %v3946_v45, 0.0  ;;  %v724_v6 = vsel %vm368_vm0, %v3949_v46, 0.0  ;;  %v431_v11 = vmul.f32 %v3954_v54, %v3954_v54  ;;  %v448_v12 = vsel %vm447_vm4, %v429_v56, %v446_v48 }
  0xbe   : > { %v712_v13 = vadd.f32 %v711_v58, %v710_v50  ;;  %v718_v14 = vrot.slane %v717_v63, 4  ;;  %v3970_v15 = vadd.f32 %v423_v59, %v422_v47  ;;  %v450_v16 = vsel %vm449_vm5, %v430_v57, %v448_v12 }
  0xbf   : > { %v706_v22 = vrot.slane %v705_v62, 2  ;;  %v725_v24 = vrot.slane %v724_v6, 4  ;;  %v452_v25 = vsel %vm451_vm6, %v431_v11, %v450_v16  ;;  %v731_v30 = vsel %vm368_vm0, %v3961_v60, 0.0 }
  0xc0   : > { %v713_v26 = vrot.slane %v712_v13, 2  ;;  %v719_v29 = vadd.f32 %v718_v14, %v717_v63  ;;  %v432_v31 = vmul.f32 %v3970_v15, %v3970_v15  ;;  %v732_v34 = vrot.slane %v731_v30, 4 }
  0xc1   : > { %v707_v32 = vadd.f32 %v706_v22, %v705_v62  ;;  %v726_v33 = vadd.f32 %v725_v24, %v724_v6  ;;  %v738_v38 = vsel %vm368_vm0, %v3974_v17, 0.0  ;;  %v745_v39 = vsel %vm368_vm0, %v3977_v21, 0.0 }
  0xc2   : > { %v714_v35 = vadd.f32 %v713_v26, %v712_v13  ;;  %v720_v37 = vrot.slane %v719_v29, 2  ;;  %v454_v40 = vsel %vm453_vm7, %v432_v31, %v452_v25  ;;  %v733_v48 = vadd.f32 %v732_v34, %v731_v30  ;;  %v344_v25 = vld [vmem:[%s3804_s13] sm:$0xff] }
  0xc3   : > { %v708_v44 = vrot.slane %v707_v32, 1  ;;  %v727_v47 = vrot.slane %v726_v33, 2  ;;  %v456_v49 = vsel %vm368_vm0, %v454_v40, 0.0  ;;  %v739_v57 = vrot.slane %v738_v38, 4 }
  0xc4   : > { %v715_v50 = vrot.slane %v714_v35, 1  ;;  %v721_v56 = vadd.f32 %v720_v37, %v719_v29  ;;  %457 = vadd.xlane.f32.xlu0 %v456_v49  ;;  %v734_v62 = vrot.slane %v733_v48, 2  ;;  %v746_v63 = vrot.slane %v745_v39, 4  ;;  %v345_v37 = vld [vmem:[%s3804_s13 + $0x8] sm:$0xff] }
  0xc5   : > { %v3993_v58 = vadd.f32 %v708_v44, %v707_v32  ;;  %v728_v59 = vadd.f32 %v727_v47, %v726_v33  ;;  %v740_v12 = vadd.f32 %v739_v57, %v738_v38  ;;  %v752_v13 = vsel %vm368_vm0, %v3990_v43, 0.0 }
  0xc6   : > { %v3995_v6 = vadd.f32 %v715_v50, %v714_v35  ;;  %v722_v11 = vrot.slane %v721_v56, 1  ;;  %v735_v16 = vadd.f32 %v734_v62, %v733_v48  ;;  %v747_v22 = vadd.f32 %v746_v63, %v745_v39 }
  0xc7   : > { %v729_v14 = vrot.slane %v728_v59, 1  ;;  %v753_v24 = vrot.slane %v752_v13, 4  ;;  %v741_v29 = vrot.slane %v740_v12, 2  ;;  %v759_v30 = vmul.f32 %v3993_v58, %v3993_v58 }
  0xc8   : > { %v4000_v26 = vadd.f32 %v722_v11, %v721_v56  ;;  %v760_v31 = vmul.f32 %v3995_v6, %v3995_v6  ;;  %v736_v33 = vrot.slane %v735_v16, 1  ;;  %v748_v34 = vrot.slane %v747_v22, 2  ;;  %v346_v56 = vld [vmem:[%s3804_s13 + $0x10] sm:$0xff] }
  0xc9   : > { %v4006_v32 = vadd.f32 %v729_v14, %v728_v59  ;;  %v754_v35 = vadd.f32 %v753_v24, %v752_v13  ;;  %v742_v38 = vadd.f32 %v741_v29, %v740_v12  ;;  %v485_v44 = vsel %vm368_vm0, %v344_v25, 0.0 }
  0xca   : > { %v761_v39 = vmul.f32 %v4000_v26, %v4000_v26  ;;  %v775_v40 = vsel %vm441_vm1, %v760_v31, %v759_v30  ;;  %v4013_v47 = vadd.f32 %v736_v33, %v735_v16  ;;  %v749_v48 = vadd.f32 %v748_v34, %v747_v22  ;;  %v347_v16 = vld [vmem:[%s3804_s13 + $0x18] sm:$0xff]  ;;  %v348_v34 = vld [vmem:[%s3804_s13 + $0x20] sm:$0xff] }
  0xcb   : > { %v755_v49 = vrot.slane %v754_v35, 2  ;;  %v762_v50 = vmul.f32 %v4006_v32, %v4006_v32  ;;  %v743_v57 = vrot.slane %v742_v38, 1  ;;  %v486_v62 = vrot.slane %v485_v44, 4 }
  0xcc   : > { %4620 = vst [vmem:[#allocation16_spill] sm:$0xff] %v4013_v47  ;;  %v776_v59 = vsel %vm443_vm2, %v761_v39, %v775_v40  ;;  %v492_v63 = vsel %vm368_vm0, %v345_v37, 0.0  ;;  %v750_v11 = vrot.slane %v749_v48, 1  ;;  %v763_v13 = vmul.f32 %v4013_v47, %v4013_v47 }
  0xcd   : > { %v756_v12 = vadd.f32 %v755_v49, %v754_v35  ;;  %v777_v14 = vsel %vm445_vm3, %v762_v50, %v776_v59  ;;  %v4024_v22 = vadd.f32 %v743_v57, %v742_v38  ;;  %v487_v24 = vadd.f32 %v486_v62, %v485_v44 }
  0xce   : > { %v493_v25 = vrot.slane %v492_v63, 4  ;;  %v499_v29 = vsel %vm368_vm0, %v346_v56, 0.0  ;;  %v4027_v30 = vadd.f32 %v750_v11, %v749_v48  ;;  %v778_v33 = vsel %vm447_vm4, %v763_v13, %v777_v14  ;;  %v349_v48 = vld [vmem:[%s3804_s13 + $0x28] sm:$0xff] }
  0xcf   : > { %4621 = vst [vmem:[#allocation17_spill] sm:$0xff] %v4024_v22  ;;  %v757_v31 = vrot.slane %v756_v12, 1  ;;  %v500_v35 = vrot.slane %v499_v29, 4  ;;  %v764_v37 = vmul.f32 %v4024_v22, %v4024_v22  ;;  %v488_v39 = vrot.slane %v487_v24, 2 }
  0xd0   : > { %4622 = vst [vmem:[#allocation18_spill] sm:$0xff] %v4027_v30  ;;  %v494_v40 = vadd.f32 %v493_v25, %v492_v63  ;;  %v506_v38 = vsel %vm368_vm0, %v347_v16, 0.0  ;;  %v765_v44 = vmul.f32 %v4027_v30, %v4027_v30  ;;  %v513_v11 = vsel %vm368_vm0, %v348_v34, 0.0  ;;  %v350_v16 = vld [vmem:[%s3804_s13 + $0x30] sm:$0xff] }
  0xd1   : > { %v4034_v49 = vadd.f32 %v757_v31, %v756_v12  ;;  %v501_v50 = vadd.f32 %v500_v35, %v499_v29  ;;  %v507_v56 = vrot.slane %v506_v38, 4  ;;  %v779_v57 = vsel %vm449_vm5, %v764_v37, %v778_v33  ;;  %v351_v33 = vld [vmem:[%s3804_s13 + $0x38] sm:$0xff] }
  0xd2   : > { %v489_v59 = vadd.f32 %v488_v39, %v487_v24  ;;  %v495_v62 = vrot.slane %v494_v40, 2  ;;  %v780_v13 = vsel %vm451_vm6, %v765_v44, %v779_v57  ;;  %v514_v30 = vrot.slane %v513_v11, 4 }
  0xd3   : > { %4623 = vst [vmem:[#allocation19_spill] sm:$0xff] %v4034_v49  ;;  %v766_v63 = vmul.f32 %v4034_v49, %v4034_v49  ;;  %v502_v12 = vrot.slane %v501_v50, 2  ;;  %v508_v14 = vadd.f32 %v507_v56, %v506_v38  ;;  %v520_v29 = vsel %vm368_vm0, %v349_v48, 0.0 }
  0xd4   : > { %v490_v25 = vrot.slane %v489_v59, 1  ;;  %v496_v31 = vadd.f32 %v495_v62, %v494_v40  ;;  %v521_v39 = vrot.slane %v520_v29, 4  ;;  %v515_v44 = vadd.f32 %v514_v30, %v513_v11 }
  0xd5   : > { %v781_v35 = vsel %vm453_vm7, %v766_v63, %v780_v13  ;;  %v503_v24 = vadd.f32 %v502_v12, %v501_v50  ;;  %v509_v37 = vrot.slane %v508_v14, 2  ;;  %v527_v40 = vsel %vm368_vm0, %v350_v16, 0.0 }
  0xd6   : > { %v783_v34 = vsel %vm368_vm0, %v781_v35, 0.0  ;;  %v4049_v22 = vadd.f32 %v490_v25, %v489_v59  ;;  %v497_v49 = vrot.slane %v496_v31, 1  ;;  %v522_v57 = vadd.f32 %v521_v39, %v520_v29 }
  0xd7   : > { %784 = vadd.xlane.f32.xlu1 %v783_v34  ;;  %v504_v38 = vrot.slane %v503_v24, 1  ;;  %v510_v56 = vadd.f32 %v509_v37, %v508_v14  ;;  %v516_v48 = vrot.slane %v515_v44, 2  ;;  %v528_v63 = vrot.slane %v527_v40, 4 }
  0xd8   : > { %v4052_v62 = vadd.f32 %v497_v49, %v496_v31  ;;  %v534_v50 = vsel %vm368_vm0, %v351_v33, 0.0  ;;  %v523_v35 = vrot.slane %v522_v57, 2  ;;  %v541_v30 = vmul.f32 %v4049_v22, %v4049_v22 }
  0xd9   : > { %v4055_v13 = vadd.f32 %v504_v38, %v503_v24  ;;  %v511_v12 = vrot.slane %v510_v56, 1  ;;  %v535_v59 = vrot.slane %v534_v50, 4  ;;  %v517_v25 = vadd.f32 %v516_v48, %v515_v44 }
  0xda   : > { %v529_v47 = vadd.f32 %v528_v63, %v527_v40  ;;  %v542_v11 = vmul.f32 %v4052_v62, %v4052_v62  ;;  %v524_v49 = vadd.f32 %v523_v35, %v522_v57  ;;  %vm3539_vm8 = vmmov 0  }
  0xdb   : > { %v4061_v14 = vadd.f32 %v511_v12, %v510_v56  ;;  %v536_v16 = vadd.f32 %v535_v59, %v534_v50  ;;  %v543_v31 = vmul.f32 %v4055_v13, %v4055_v13  ;;  %v518_v29 = vrot.slane %v517_v25, 1 }
  0xdc   : > { %v530_v33 = vrot.slane %v529_v47, 2  ;;  %v557_v24 = vsel %vm441_vm1, %v542_v11, %v541_v30  ;;  %v525_v37 = vrot.slane %v524_v49, 1  ;;  %vm983_vm9 = vcmask 1040384  }
  0xdd   : > { %v537_v39 = vrot.slane %v536_v16, 2  ;;  %v544_v34 = vmul.f32 %v4061_v14, %v4061_v14  ;;  %v558_v44 = vsel %vm443_vm2, %v543_v31, %v557_v24  ;;  %v4069_v38 = vadd.f32 %v518_v29, %v517_v25 }
  0xde   : > { %v531_v56 = vadd.f32 %v530_v33, %v529_v47  ;;  %v4071_v40 = vadd.f32 %v525_v37, %v524_v49  ;;  %v3538_v33 = vmov 0.0   ;;  %v812_v24 = vmul.f32 %v3922_v27, %v3922_v27 }
  0xdf   : > { %v538_v57 = vadd.f32 %v537_v39, %v536_v16  ;;  %v559_v48 = vsel %vm445_vm3, %v544_v34, %v558_v44  ;;  %v545_v50 = vmul.f32 %v4069_v38, %v4069_v38  ;;  %3105 = vmatprep.subr.mxu0 %v3538_v33  ;;  %3110 = vmatprep.subr.mxu1 %v3538_v33  ;;  %vm1658_vm10 = vcmask 58368  }
  0xe0   : > { %v532_v63 = vrot.slane %v531_v56, 1  ;;  %v546_v35 = vmul.f32 %v4071_v40, %v4071_v40  ;;  %3106 = vmatpush3.xpose.msk.msra.mxu0 %vm368_vm0, %v3922_v27  ;;  %3111 = vmatpush3.xpose.msk.msra.mxu1 %vm368_vm0, %v3933_v36  ;;  %v868_v37 = vmul.f32 %v3820_v0, %v3820_v0  ;;  %v813_v39 = vmul.f32 %v3933_v36, %v3933_v36 }
  0xe1   : > { %v539_v12 = vrot.slane %v538_v57, 1  ;;  %v560_v30 = vsel %vm447_vm4, %v545_v50, %v559_v48  ;;  %3107 = vmatprep.mubr.msk.f32.mxu0 %vm3539_vm8, %v3538_v33  ;;  %3115 = vmatprep.subr.mxu0 %v3538_v33  ;;  %v869_v34 = vmul.f32 %v3823_v1, %v3823_v1  ;;  %v820_v44 = vsel %vm368_vm0, %v812_v24, 0.0 }
  0xe2   : > { %v4078_v59 = vadd.f32 %v532_v63, %v531_v56  ;;  %v561_v47 = vsel %vm449_vm5, %v546_v35, %v560_v30  ;;  %3112 = vmatprep.mubr.msk.f32.mxu1 %vm3539_vm8, %v3538_v33  ;;  %3120 = vmatprep.subr.mxu1 %v3538_v33  ;;  %v823_v56 = vsel %vm368_vm0, %v813_v39, 0.0  ;;  %v814_v48 = vmul.f32 %v3946_v45, %v3946_v45 }
  0xe3   : > { %v4081_v25 = vadd.f32 %v539_v12, %v538_v57  ;;  %821 = vadd.xlane.f32.xlu0 %v820_v44  ;;  %v876_v57 = vsel %vm368_vm0, %v868_v37, 0.0  ;;  %v879_v27 = vsel %vm368_vm0, %v869_v34, 0.0  ;;  %v870_v63 = vmul.f32 %v3826_v2, %v3826_v2 }
  0xe4   : > { %v547_v11 = vmul.f32 %v4078_v59, %v4078_v59  ;;  %v826_v36 = vsel %vm368_vm0, %v814_v48, 0.0  ;;  %v815_v50 = vmul.f32 %v3949_v46, %v3949_v46  ;;  %v871_v35 = vmul.f32 %v3829_v3, %v3829_v3 }
  0xe5   : > { %v548_v49 = vmul.f32 %v4081_v25, %v4081_v25  ;;  %v882_v12 = vsel %vm368_vm0, %v870_v63, 0.0  ;;  %v818_v24 = vmul.f32 %v3977_v21, %v3977_v21  ;;  %v874_v37 = vmul.f32 %v3844_v9, %v3844_v9 }
  0xe6   : > { %v562_v16 = vsel %vm451_vm6, %v547_v11, %v561_v47  ;;  %v829_v30 = vsel %vm368_vm0, %v815_v50, 0.0  ;;  %v816_v47 = vmul.f32 %v3961_v60, %v3961_v60  ;;  %v885_v2 = vsel %vm368_vm0, %v871_v35, 0.0 }
  0xe7   : > { %v563_v31 = vsel %vm453_vm7, %v548_v49, %v562_v16  ;;  %877 = vadd.xlane.f32.xlu0 %v876_v57  ;;  %v872_v11 = vmul.f32 %v3832_v4, %v3832_v4  ;;  %v817_v16 = vmul.f32 %v3974_v17, %v3974_v17  ;;  %v838_v39 = vsel %vm368_vm0, %v818_v24, 0.0 }
  0xe8   : > { %v565_v29 = vsel %vm368_vm0, %v563_v31, 0.0  ;;  %v832_v49 = vsel %vm368_vm0, %v816_v47, 0.0  ;;  %v873_v31 = vmul.f32 %v3835_v5, %v3835_v5  ;;  %v819_v34 = vmul.f32 %v3990_v43, %v3990_v43 }
  0xe9   : > { %566 = vadd.xlane.f32.xlu1 %v565_v29  ;;  %v888_v3 = vsel %vm368_vm0, %v872_v11, 0.0  ;;  %v835_v29 = vsel %vm368_vm0, %v817_v16, 0.0  ;;  %v894_v5 = vsel %vm368_vm0, %v874_v37, 0.0  ;;  %v875_v44 = vmul.f32 %v3847_v10, %v3847_v10 }
  0xea   : > { %v891_v4 = vsel %vm368_vm0, %v873_v31, 0.0  ;;  %vm2857_vm11 = vcmask 15360   ;;  %vm2867_vm12 = vcmask 57344  }
  0xeb   : > { %827 = vadd.xlane.f32.xlu0 %v826_v36  ;;  %v897_v57 = vsel %vm368_vm0, %v875_v44, 0.0 }
  0xed   : > { %824 = vadd.xlane.f32.xlu1 %v823_v56  ;;  %v841_v56 = vsel %vm368_vm0, %v819_v34, 0.0 }
  0xef   : > { %830 = vadd.xlane.f32.xlu0 %v829_v30 }
  0xf1   : > { %880 = vadd.xlane.f32.xlu1 %v879_v27 }
  0xf3   : > { %833 = vadd.xlane.f32.xlu0 %v832_v49 }
  0xf5   : > { %883 = vadd.xlane.f32.xlu1 %v882_v12 }
  0xf7   : > { %836 = vadd.xlane.f32.xlu0 %v835_v29 }
  0xf9   : > { %886 = vadd.xlane.f32.xlu1 %v885_v2 }
  0xfb   : > { %839 = vadd.xlane.f32.xlu0 %v838_v39 }
  0xfd   : > { %889 = vadd.xlane.f32.xlu1 %v888_v3 }
  0xff   : > { %842 = vadd.xlane.f32.xlu0 %v841_v56 }
 0x101   : > { %892 = vadd.xlane.f32.xlu1 %v891_v4 }
 0x105   : > { %895 = vadd.xlane.f32.xlu1 %v894_v5 }
 0x109   : > { %898 = vadd.xlane.f32.xlu1 %v897_v57 }
 0x13d   : > { %v676_v9 = vpop.xlane.xlu0 %675 }
 0x13e   : > { %v677_v48 = vmax.f32 %v676_v9, 6.4e-23 }
 0x140   : > { %3250 = vrsqrt.f32 %v677_v48 }
 0x14a   : > { %v3251_v36 = vpop.eup %3250 }
 0x14b   : > { %v680_v50 = vrot.slane %v3251_v36, 1  ;;  %v681_v12 = vrot.slane %v3251_v36, 2  ;;  %v695_v35 = vmul.f32 %v3251_v36, %v3859_v51  ;;  %v682_v30 = vrot.slane %v3251_v36, 3 }
 0x14c   : > { %v683_v47 = vrot.slane %v3251_v36, 4  ;;  %v684_v11 = vrot.slane %v3251_v36, 5  ;;  %v685_v49 = vrot.slane %v3251_v36, 6  ;;  %v686_v16 = vrot.slane %v3251_v36, 7 }
 0x14d   : > { %v696_v10 = vmul.f32 %v680_v50, %v3861_v52  ;;  %v697_v2 = vmul.f32 %v681_v12, %v3863_v53  ;;  %v967_v31 = vrot.slane %v695_v35, 7  ;;  %v698_v24 = vmul.f32 %v682_v30, %v3865_v55 }
 0x14e   : > { %v699_v4 = vmul.f32 %v683_v47, %v3869_v61 }
 0x14f   : > { %v968_v29 = vrot.slane %v696_v10, 7  ;;  %v969_v34 = vrot.slane %v697_v2, 7 }
 0x151   : > { %v458_v27 = vpop.xlane.xlu0 %457 }
 0x152   : > { %v459_v63 = vmax.f32 %v458_v27, 6.4e-23 }
 0x154   : > { %3252 = vrsqrt.f32 %v459_v63 }
 0x15e   : > { %v3253_v3 = vpop.eup %3252 }
 0x15f   : > { %v477_v37 = vmul.f32 %v3253_v3, %v3915_v18  ;;  %v462_v51 = vrot.slane %v3253_v3, 1  ;;  %v463_v39 = vrot.slane %v3253_v3, 2  ;;  %v464_v52 = vrot.slane %v3253_v3, 3 }
 0x160   : > { %v465_v5 = vrot.slane %v3253_v3, 4  ;;  %v466_v44 = vrot.slane %v3253_v3, 5  ;;  %v467_v53 = vrot.slane %v3253_v3, 6 }
 0x161   : > { %v924_v56 = vmul.f32 %v695_v35, %v477_v37  ;;  %v984_v57 = vsel %vm983_vm9, %v477_v37, %v967_v31  ;;  %v478_v9 = vmul.f32 %v462_v51, %v3917_v20  ;;  %v479_v48 = vmul.f32 %v463_v39, %v3919_v23 }
 0x162   : > { %3108 = vmatmul.mubr.msk.f32.vlgmr.msra.gmra.mrb[0].mxu0 %vm368_vm0, %v984_v57  ;;  %v480_v55 = vmul.f32 %v464_v52, %v3924_v28  ;;  %v481_v61 = vmul.f32 %v465_v5, %v3940_v41  ;;  %v482_v18 = vmul.f32 %v466_v44, %v3942_v42  ;;  %v483_v27 = vmul.f32 %v467_v53, %v3954_v54 }
 0x163   : > { %3116 = vmatpush3.xpose.msk.msra.mxu0 %vm368_vm0, %v3946_v45  ;;  %v925_v63 = vmul.f32 %v696_v10, %v478_v9  ;;  %v985_v36 = vsel %vm983_vm9, %v478_v9, %v968_v29  ;;  %3117 = vmatprep.mubr.msk.f32.mxu0 %vm3539_vm8, %v3538_v33  ;;  %v926_v20 = vmul.f32 %v697_v2, %v479_v48  ;;  %v468_v23 = vrot.slane %v3253_v3, 7 }
 0x164   : > { %3113 = vmatmul.mubr.msk.f32.vlgmr.msra.gmra.mrb[0].mxu1 %vm368_vm0, %v985_v36  ;;  %3125 = vmatprep.subr.mxu0 %v3538_v33  ;;  %v927_v28 = vmul.f32 %v698_v24, %v480_v55  ;;  %v970_v41 = vrot.slane %v698_v24, 7  ;;  %v700_v42 = vmul.f32 %v684_v11, %v3877_v7  ;;  %v701_v54 = vmul.f32 %v685_v49, %v3879_v8  ;;  %v785_v3 = vpop.xlane.xlu1 %784 }
 0x165   : > { %v940_v50 = vrot.slane %v925_v63, 7  ;;  %3121 = vmatpush3.xpose.msk.msra.mxu1 %vm368_vm0, %v3949_v46  ;;  %v942_v45 = vrot.slane %v926_v20, 6  ;;  %v986_v12 = vsel %vm983_vm9, %v479_v48, %v969_v34  ;;  %3122 = vmatprep.mubr.msk.f32.mxu1 %vm3539_vm8, %v3538_v33  ;;  %v928_v35 = vmul.f32 %v699_v4, %v481_v61 }
 0x166   : > { %3118 = vmatmul.mubr.msk.f32.vlgmr.msra.gmra.mrb[2].mxu0 %vm368_vm0, %v986_v12  ;;  %3130 = vmatprep.subr.mxu1 %v3538_v33  ;;  %v987_v10 = vsel %vm983_vm9, %v480_v55, %v970_v41  ;;  %v702_v7 = vmul.f32 %v686_v16, %v3890_v19  ;;  %v971_v8 = vrot.slane %v699_v4, 7  ;;  %v484_v46 = vmul.f32 %v468_v23, %v3970_v15  ;;  %v4624_v23 = vld [vmem:[#allocation16_spill] sm:$0xff]  ;;  %v4625_v41 = vld [vmem:[#allocation17_spill] sm:$0xff] }
 0x167   : > { %3126 = vmatpush3.xpose.msk.msra.mxu0 %vm368_vm0, %v3961_v60  ;;  %3127 = vmatprep.mubr.msk.f32.mxu0 %vm3539_vm8, %v3538_v33  ;;  %v929_v30 = vmul.f32 %v700_v42, %v482_v18  ;;  %v930_v47 = vmul.f32 %v701_v54, %v483_v27  ;;  %v944_v2 = vrot.slane %v927_v28, 5  ;;  %v972_v11 = vrot.slane %v700_v42, 7 }
 0x168   : > { %3123 = vmatmul.mubr.msk.f32.vlgmr.msra.gmra.mrb[2].mxu1 %vm368_vm0, %v987_v10  ;;  %3135 = vmatprep.subr.mxu0 %v3538_v33  ;;  %v941_v49 = vsel %vm441_vm1, %v940_v50, %v924_v56  ;;  %v988_v19 = vsel %vm983_vm9, %v481_v61, %v971_v8  ;;  %v931_v60 = vmul.f32 %v702_v7, %v484_v46  ;;  %v946_v16 = vrot.slane %v928_v35, 4  ;;  %v4626_v10 = vld [vmem:[#allocation18_spill] sm:$0xff] }
 0x169   : > { %3131 = vmatpush3.xpose.msk.msra.mxu1 %vm368_vm0, %v3974_v17  ;;  %3132 = vmatprep.mubr.msk.f32.mxu1 %vm3539_vm8, %v3538_v33  ;;  %v943_v15 = vsel %vm443_vm2, %v942_v45, %v941_v49  ;;  %v973_v31 = vrot.slane %v701_v54, 7  ;;  %v948_v24 = vrot.slane %v929_v30, 3  ;;  %v786_v4 = vmax.f32 %v785_v3, 6.4e-23  ;;  %v3330_v3 = vld [vmem:[%s3810_s23 + $0x10] sm:$0xff] }
 0x16a   : > { %3128 = vmatmul.mubr.msk.f32.vlgmr.msra.gmra.mrb[4].mxu0 %vm368_vm0, %v988_v19  ;;  %3140 = vmatprep.subr.mxu1 %v3538_v33  ;;  %v945_v29 = vsel %vm445_vm3, %v944_v2, %v943_v15  ;;  %v989_v17 = vsel %vm983_vm9, %v482_v18, %v972_v11  ;;  %v950_v51 = vrot.slane %v930_v47, 2  ;;  %v952_v52 = vrot.slane %v931_v60, 1 }
 0x16b   : > { %3136 = vmatpush3.xpose.msk.msra.mxu0 %vm368_vm0, %v3977_v21  ;;  %3137 = vmatprep.mubr.msk.f32.mxu0 %vm3539_vm8, %v3538_v33  ;;  %v947_v37 = vsel %vm447_vm4, %v946_v16, %v945_v29  ;;  %v990_v21 = vsel %vm983_vm9, %v483_v27, %v973_v31  ;;  %v974_v34 = vrot.slane %v702_v7, 7  ;;  %3254 = vrsqrt.f32 %v786_v4 }
 0x16c   : > { %3133 = vmatmul.mubr.msk.f32.vlgmr.msra.gmra.mrb[4].mxu1 %vm368_vm0, %v989_v17  ;;  %3145 = vmatprep.subr.mxu0 %v3538_v33  ;;  %v949_v39 = vsel %vm449_vm5, %v948_v24, %v947_v37  ;;  %v3331_v24 = vld [vmem:[%s3810_s23 + $0x18] sm:$0xff] }
 0x16d   : > { %3141 = vmatpush3.xpose.msk.msra.mxu1 %vm368_vm0, %v3990_v43  ;;  %3142 = vmatprep.mubr.msk.f32.mxu1 %vm3539_vm8, %v3538_v33  ;;  %v951_v5 = vsel %vm451_vm6, %v950_v51, %v949_v39  ;;  %v991_v43 = vsel %vm983_vm9, %v484_v46, %v974_v34  ;;  %v3332_v34 = vld [vmem:[%s3810_s23 + $0x20] sm:$0xff] }
 0x16e   : > { %3138 = vmatmul.mubr.msk.f32.vlgmr.msra.gmra.mrb[6].mxu0 %vm368_vm0, %v990_v21  ;;  %3150 = vmatprep.subr.mxu1 %v3538_v33  ;;  %v4218_v44 = vsel %vm453_vm7, %v952_v52, %v951_v5 }
 0x16f   : > { %3146 = vmatpush3.xpose.msk.msra.mxu0 %vm368_vm0, %v3820_v0  ;;  %3147 = vmatprep.mubr.msk.f32.mxu0 %vm3539_vm8, %v3538_v33 }
 0x170   : > { %3143 = vmatmul.mubr.msk.f32.vlgmr.msra.gmra.mrb[6].mxu1 %vm368_vm0, %v991_v43  ;;  %3155 = vmatprep.subr.mxu0 %v3538_v33 }
 0x171   : > { %3151 = vmatpush3.xpose.msk.msra.mxu1 %vm368_vm0, %v3823_v1  ;;  %3152 = vmatprep.mubr.msk.f32.mxu1 %vm3539_vm8, %v3538_v33 }
 0x172   : > { %3160 = vmatprep.subr.mxu1 %v3538_v33 }
 0x175   : > { %v3255_v0 = vpop.eup %3254 }
 0x176   : > { %v567_v53 = vpop.xlane.xlu1 %566  ;;  %v789_v57 = vrot.slane %v3255_v0, 1  ;;  %v790_v9 = vrot.slane %v3255_v0, 2  ;;  %v791_v48 = vrot.slane %v3255_v0, 3  ;;  %v792_v55 = vrot.slane %v3255_v0, 4 }
 0x177   : > { %v568_v56 = vmax.f32 %v567_v53, 6.4e-23  ;;  %v793_v61 = vrot.slane %v3255_v0, 5  ;;  %v794_v18 = vrot.slane %v3255_v0, 6  ;;  %v804_v27 = vmul.f32 %v3255_v0, %v3993_v58 }
 0x178   : > { %v805_v63 = vmul.f32 %v789_v57, %v3995_v6  ;;  %v806_v1 = vmul.f32 %v790_v9, %v4000_v26  ;;  %v807_v36 = vmul.f32 %v791_v48, %v4006_v32  ;;  %v4237_v28 = vmul.f32 %v792_v55, %v4624_v23  ;;  %v3333_v9 = vld [vmem:[%s3810_s23 + $0x28] sm:$0xff] }
 0x179   : > { %3256 = vrsqrt.f32 %v568_v56  ;;  %v1935_v20 = vrot.slane %v804_v27, 7  ;;  %v4240_v42 = vmul.f32 %v793_v61, %v4625_v41  ;;  %v795_v54 = vrot.slane %v3255_v0, 7  ;;  %v3335_v41 = vld [vmem:[%s3810_s23 + $0x38] sm:$0xff] }
 0x17a   : > { %v1936_v45 = vrot.slane %v805_v63, 7  ;;  %v1937_v12 = vrot.slane %v806_v1, 7  ;;  %v1938_v35 = vrot.slane %v807_v36, 7  ;;  %v4243_v58 = vmul.f32 %v794_v18, %v4626_v10 }
 0x17b   : > { %v1940_v52 = vrot.slane %v4240_v42, 7 }
 0x183   : > { %v3257_v50 = vpop.eup %3256 }
 0x184   : > { %v586_v6 = vmul.f32 %v3257_v50, %v4049_v22  ;;  %v571_v26 = vrot.slane %v3257_v50, 1  ;;  %v572_v32 = vrot.slane %v3257_v50, 2  ;;  %v573_v7 = vrot.slane %v3257_v50, 3 }
 0x185   : > { %v574_v8 = vrot.slane %v3257_v50, 4  ;;  %v575_v46 = vrot.slane %v3257_v50, 5  ;;  %v576_v30 = vrot.slane %v3257_v50, 6  ;;  %v577_v47 = vrot.slane %v3257_v50, 7 }
 0x186   : > { %v1892_v2 = vmul.f32 %v804_v27, %v586_v6  ;;  %v1951_v11 = vsel %vm983_vm9, %v586_v6, %v1935_v20  ;;  %v587_v49 = vmul.f32 %v571_v26, %v4052_v62  ;;  %v588_v19 = vmul.f32 %v572_v32, %v4055_v13 }
 0x187   : > { %3148 = vmatmul.mubr.msk.f32.vlgmr.msra.gmra.mrb[8].mxu0 %vm368_vm0, %v1951_v11  ;;  %v589_v60 = vmul.f32 %v573_v7, %v4061_v14  ;;  %v590_v22 = vmul.f32 %v574_v8, %v4069_v38  ;;  %v591_v15 = vmul.f32 %v575_v46, %v4071_v40  ;;  %v592_v16 = vmul.f32 %v576_v30, %v4078_v59  ;;  %v4627_v38 = vld [vmem:[#allocation19_spill] sm:$0xff] }
 0x188   : > { %3156 = vmatpush3.xpose.msk.msra.mxu0 %vm368_vm0, %v3330_v3  ;;  %v1893_v31 = vmul.f32 %v805_v63, %v587_v49  ;;  %v1952_v29 = vsel %vm983_vm9, %v587_v49, %v1936_v45  ;;  %3157 = vmatprep.mubr.msk.f32.mxu0 %vm3539_vm8, %v3538_v33  ;;  %v1894_v62 = vmul.f32 %v806_v1, %v588_v19  ;;  %v1939_v14 = vrot.slane %v4237_v28, 7  ;;  %v3334_v1 = vld [vmem:[%s3810_s23 + $0x30] sm:$0xff]  ;;  %v822_v45 = vpop.xlane.xlu0 %821 }
 0x189   : > { %3153 = vmatmul.mubr.msk.f32.vlgmr.msra.gmra.mrb[8].mxu1 %vm368_vm0, %v1952_v29  ;;  %3165 = vmatprep.subr.mxu0 %v3538_v33  ;;  %v1895_v13 = vmul.f32 %v807_v36, %v589_v60  ;;  %v811_v40 = vmul.f32 %v795_v54, %v4627_v38  ;;  %v1953_v17 = vsel %vm983_vm9, %v588_v19, %v1937_v12  ;;  %v844_v6 = vmax.f32 %v822_v45, 1e-24 }
 0x18a   : > { %v1908_v59 = vrot.slane %v1893_v31, 7  ;;  %3161 = vmatpush3.xpose.msk.msra.mxu1 %vm368_vm0, %v3331_v24  ;;  %v1910_v4 = vrot.slane %v1894_v62, 6  ;;  %3162 = vmatprep.mubr.msk.f32.mxu1 %vm3539_vm8, %v3538_v33  ;;  %v1896_v37 = vmul.f32 %v4237_v28, %v590_v22  ;;  %v1954_v39 = vsel %vm983_vm9, %v589_v60, %v1938_v35 }
 0x18b   : > { %3158 = vmatmul.mubr.msk.f32.vlgmr.msra.gmra.mrb[10].mxu0 %vm368_vm0, %v1953_v17  ;;  %v1912_v51 = vrot.slane %v1895_v13, 5  ;;  %3170 = vmatprep.subr.mxu1 %v3538_v33  ;;  %v593_v21 = vmul.f32 %v577_v47, %v4081_v25  ;;  %v1897_v5 = vmul.f32 %v4240_v42, %v591_v15  ;;  %v1898_v43 = vmul.f32 %v4243_v58, %v592_v16 }
 0x18c   : > { %3166 = vmatpush3.xpose.msk.msra.mxu0 %vm368_vm0, %v3332_v34  ;;  %3167 = vmatprep.mubr.msk.f32.mxu0 %vm3539_vm8, %v3538_v33  ;;  %v1909_v53 = vsel %vm441_vm1, %v1908_v59, %v1892_v2  ;;  %v1914_v56 = vrot.slane %v1896_v37, 4  ;;  %v1941_v25 = vrot.slane %v4243_v58, 7  ;;  %v1955_v48 = vsel %vm983_vm9, %v590_v22, %v1939_v14  ;;  %v4313_v12 = vpop.xlane.xlu0 %877  ;;  %v825_v58 = vpop.xlane.xlu1 %824 }
 0x18d   : > { %3163 = vmatmul.mubr.msk.f32.vlgmr.msra.gmra.mrb[10].mxu1 %vm368_vm0, %v1954_v39  ;;  %3175 = vmatprep.subr.mxu0 %v3538_v33  ;;  %v1899_v0 = vmul.f32 %v811_v40, %v593_v21  ;;  %v1911_v57 = vsel %vm443_vm2, %v1910_v4, %v1909_v53  ;;  %v1916_v61 = vrot.slane %v1897_v5, 3  ;;  %v1918_v18 = vrot.slane %v1898_v43, 2 }
 0x18e   : > { %3171 = vmatpush3.xpose.msk.msra.mxu1 %vm368_vm0, %v3333_v9  ;;  %3172 = vmatprep.mubr.msk.f32.mxu1 %vm3539_vm8, %v3538_v33  ;;  %v1913_v55 = vsel %vm445_vm3, %v1912_v51, %v1911_v57  ;;  %v1956_v36 = vsel %vm983_vm9, %v591_v15, %v1940_v52  ;;  %v1942_v20 = vrot.slane %v811_v40, 7  ;;  %v1957_v42 = vsel %vm983_vm9, %v592_v16, %v1941_v25 }
 0x18f   : > { %3168 = vmatmul.mubr.msk.f32.vlgmr.msra.gmra.mrb[12].mxu0 %vm368_vm0, %v1955_v48  ;;  %3180 = vmatprep.subr.mxu1 %v3538_v33  ;;  %v1915_v27 = vsel %vm447_vm4, %v1914_v56, %v1913_v55  ;;  %v1920_v63 = vrot.slane %v1899_v0, 1  ;;  %v845_v26 = vmax.f32 %v825_v58, 1e-24  ;;  %3258 = vrsqrt.f32 %v844_v6 }
 0x190   : > { %3176 = vmatpush3.xpose.msk.msra.mxu0 %vm368_vm0, %v3334_v1  ;;  %3177 = vmatprep.mubr.msk.f32.mxu0 %vm3539_vm8, %v3538_v33  ;;  %v1917_v23 = vsel %vm449_vm5, %v1916_v61, %v1915_v27  ;;  %v1958_v50 = vsel %vm983_vm9, %v593_v21, %v1942_v20  ;;  %v828_v35 = vpop.xlane.xlu0 %827  ;;  %v1608_v8 = vlaneseq  ;;  %v881_v13 = vpop.xlane.xlu1 %880 }
 0x191   : > { %3173 = vmatmul.mubr.msk.f32.vlgmr.msra.gmra.mrb[12].mxu1 %vm368_vm0, %v1956_v36  ;;  %v1919_v28 = vsel %vm451_vm6, %v1918_v18, %v1917_v23  ;;  %v846_v32 = vmax.f32 %v828_v35, 1e-24  ;;  %3260 = vrsqrt.f32 %v845_v26  ;;  %v901_v6 = vmax.f32 %v881_v13, 1e-24 }
 0x192   : > { %3181 = vmatpush3.xpose.msk.msra.mxu1 %vm368_vm0, %v3335_v41  ;;  %3182 = vmatprep.mubr.msk.f32.mxu1 %vm3539_vm8, %v3538_v33  ;;  %v4308_v54 = vsel %vm453_vm7, %v1920_v63, %v1919_v28  ;;  %v1609_v47 = vand.u32 127, %v1608_v8  ;;  %v4315_v2 = vshrl.u32 %v1608_v8, 7 }
 0x193   : > { %3178 = vmatmul.mubr.msk.f32.vlgmr.msra.gmra.mrb[14].mxu0 %vm368_vm0, %v1957_v42  ;;  %3262 = vrsqrt.f32 %v846_v32 }
 0x194   : > { %v831_v10 = vpop.xlane.xlu0 %830  ;;  %v4318_v15 = vsub.s32 %v1609_v47, %v4315_v2  ;;  %v884_v52 = vpop.xlane.xlu1 %883 }
 0x195   : > { %3183 = vmatmul.mubr.msk.f32.vlgmr.msra.gmra.mrb[14].mxu1 %vm368_vm0, %v1958_v50  ;;  %v847_v7 = vmax.f32 %v831_v10, 1e-24  ;;  %v900_v10 = vmax.f32 %v4313_v12, 1e-24 }
 0x197   : > { %3264 = vrsqrt.f32 %v847_v7 }
 0x198   : > { %v834_v33 = vpop.xlane.xlu0 %833  ;;  %v887_v36 = vpop.xlane.xlu1 %886 }
 0x199   : > { %v848_v46 = vmax.f32 %v834_v33, 1e-24  ;;  %v3259_v11 = vpop.eup %3258 }
 0x19a   : > { %v860_v60 = vmul.f32 10.0, %v3259_v11  ;;  %v902_v11 = vmax.f32 %v884_v52, 1e-24 }
 0x19b   : > { %3266 = vrsqrt.f32 %v848_v46  ;;  %v3261_v19 = vpop.eup %3260 }
 0x19c   : > { %v837_v30 = vpop.xlane.xlu0 %836  ;;  %v861_v31 = vmul.f32 10.0, %v3261_v19  ;;  %v1613_v14 = vrot.slane %v860_v60, %v4318_v15  ;;  %v890_v7 = vpop.xlane.xlu1 %889  ;;  %v903_v19 = vmax.f32 %v887_v36, 1e-24 }
 0x19d   : > { %v849_v49 = vmax.f32 %v837_v30, 1e-24  ;;  %v3263_v16 = vpop.eup %3262 }
 0x19e   : > { %v862_v62 = vmul.f32 10.0, %v3263_v16  ;;  %v1617_v40 = vrot.slane %v861_v31, %v4318_v15  ;;  %v904_v16 = vmax.f32 %v890_v7, 1e-24 }
 0x19f   : > { %3268 = vrsqrt.f32 %v849_v49 }
 0x1a0   : > { %v840_v22 = vpop.xlane.xlu0 %839  ;;  %v1621_v37 = vrot.slane %v862_v62, %v4318_v15  ;;  %v893_v60 = vpop.xlane.xlu1 %892 }
 0x1a1   : > { %v850_v3 = vmax.f32 %v840_v22, 1e-24  ;;  %v3265_v29 = vpop.eup %3264  ;;  %v905_v13 = vmax.f32 %v893_v60, 1e-24 }
 0x1a2   : > { %v863_v38 = vmul.f32 10.0, %v3265_v29 }
 0x1a3   : > { %3270 = vrsqrt.f32 %v850_v3 }
 0x1a4   : > { %v1625_v43 = vrot.slane %v863_v38, %v4318_v15  ;;  %v843_v41 = vpop.xlane.xlu0 %842  ;;  %3272 = vrsqrt.f32 %v900_v10  ;;  %v896_v29 = vpop.xlane.xlu1 %895 }
 0x1a5   : > { %v3267_v59 = vpop.eup %3266  ;;  %v851_v32 = vmax.f32 %v843_v41, 1e-24  ;;  %3274 = vrsqrt.f32 %v901_v6 }
 0x1a6   : > { %v864_v39 = vmul.f32 10.0, %v3267_v59 }
 0x1a7   : > { %3276 = vrsqrt.f32 %v851_v32 }
 0x1a8   : > { %v1629_v18 = vrot.slane %v864_v39, %v4318_v15  ;;  %3278 = vrsqrt.f32 %v902_v11  ;;  %v955_v11 = vsel %vm368_vm0, %v4218_v44, 0.0 }
 0x1a9   : > { %v3269_v53 = vpop.eup %3268  ;;  %3280 = vrsqrt.f32 %v903_v19 }
 0x1aa   : > { %v865_v48 = vmul.f32 10.0, %v3269_v53  ;;  %3282 = vrsqrt.f32 %v904_v16 }
 0x1ab   : > { %3284 = vrsqrt.f32 %v905_v13 }
 0x1ac   : > { %v1633_v50 = vrot.slane %v865_v48, %v4318_v15 }
 0x1ad   : > { %v3271_v63 = vpop.eup %3270 }
 0x1ae   : > { %v866_v28 = vmul.f32 10.0, %v3271_v63  ;;  %v3273_v3 = vpop.eup %3272 }
 0x1af   : > { %v3275_v31 = vpop.eup %3274  ;;  %v916_v38 = vmul.f32 10.0, %v3273_v3 }
 0x1b0   : > { %v1637_v46 = vrot.slane %v866_v28, %v4318_v15 }
 0x1b1   : > { %v3277_v62 = vpop.eup %3276  ;;  %v2578_v52 = vrot.slane %v916_v38, %v4318_v15 }
 0x1b2   : > { %v867_v59 = vmul.f32 10.0, %v3277_v62 }
 0x1b4   : > { %v1641_v39 = vrot.slane %v867_v59, %v4318_v15 }
 0x235   : > { %v1064_v24 = vpop.f32.mrb[0].mxu0 }
 0x236   : > { %v4322_v4 = vmul.f32 %v1613_v14, %v1064_v24  ;;  %v3109_v17 = vpop.f32.mrb[1].mxu0  ;;  %v3279_v14 = vpop.eup %3278  ;;  %v906_v24 = vmax.f32 %v896_v29, 1e-24 }
 0x237   : > { %v1140_v51 = vpop.f32.mrb[0].mxu1  ;;  %v918_v17 = vmul.f32 10.0, %v3279_v14 }
 0x238   : > { %v4325_v21 = vmul.f32 %v1617_v40, %v1140_v51  ;;  %v3114_v34 = vpop.f32.mrb[1].mxu1  ;;  %v1659_v5 = vsel %vm1658_vm10, %v4322_v4, -inf  ;;  %v917_v40 = vmul.f32 10.0, %v3275_v31  ;;  %v3281_v51 = vpop.eup %3280  ;;  %3286 = vrsqrt.f32 %v906_v24 }
 0x239   : > { %v1216_v56 = vpop.f32.mrb[2].mxu0  ;;  %1660 = vmax.xlane.f32.xlu0 %v1659_v5  ;;  %v919_v53 = vmul.f32 10.0, %v3281_v51 }
 0x23a   : > { %v4330_v25 = vmul.f32 %v1621_v37, %v1216_v56  ;;  %v3119_v0 = vpop.f32.mrb[3].mxu0  ;;  %v1662_v57 = vsel %vm1658_vm10, %v4325_v21, -inf  ;;  %v899_v37 = vpop.xlane.xlu1 %898  ;;  %v2582_v34 = vrot.slane %v917_v40, %v4318_v15 }
 0x23b   : > { %1663 = vmax.xlane.f32.xlu1 %v1662_v57  ;;  %v1292_v9 = vpop.f32.mrb[2].mxu1  ;;  %v907_v5 = vmax.f32 %v899_v37, 1e-24  ;;  %v2586_v57 = vrot.slane %v918_v17, %v4318_v15  ;;  %v2590_v41 = vrot.slane %v919_v53, %v4318_v15 }
 0x23c   : > { %v4334_v55 = vmul.f32 %v1625_v43, %v1292_v9  ;;  %v3124_v61 = vpop.f32.mrb[3].mxu1  ;;  %v1665_v27 = vsel %vm1658_vm10, %v4330_v25, -inf  ;;  %v3283_v9 = vpop.eup %3282 }
 0x23d   : > { %v1368_v1 = vpop.f32.mrb[4].mxu0  ;;  %1666 = vmax.xlane.f32.xlu0 %v1665_v27  ;;  %3288 = vrsqrt.f32 %v907_v5  ;;  %v920_v36 = vmul.f32 10.0, %v3283_v9 }
 0x23e   : > { %v3129_v20 = vpop.f32.mrb[5].mxu0  ;;  %v4339_v42 = vmul.f32 %v1629_v18, %v1368_v1  ;;  %v1668_v35 = vsel %vm1658_vm10, %v4334_v55, -inf }
 0x23f   : > { %v1444_v23 = vpop.f32.mrb[4].mxu1  ;;  %v2594_v32 = vrot.slane %v920_v36, %v4318_v15 }
 0x240   : > { %v3134_v45 = vpop.f32.mrb[5].mxu1  ;;  %v4345_v8 = vmul.f32 %v1633_v50, %v1444_v23  ;;  %v1671_v47 = vsel %vm1658_vm10, %v4339_v42, -inf  ;;  %v3285_v50 = vpop.eup %3284 }
 0x241   : > { %v1520_v58 = vpop.f32.mrb[6].mxu0  ;;  %1669 = vmax.xlane.f32.xlu0 %v1668_v35  ;;  %v921_v6 = vmul.f32 10.0, %v3285_v50 }
 0x242   : > { %v3139_v26 = vpop.f32.mrb[7].mxu0  ;;  %v4350_v12 = vmul.f32 %v1637_v46, %v1520_v58  ;;  %v1674_v49 = vsel %vm1658_vm10, %v4345_v8, -inf  ;;  %v3287_v46 = vpop.eup %3286 }
 0x243   : > { %v1596_v33 = vpop.f32.mrb[6].mxu1  ;;  %v922_v19 = vmul.f32 10.0, %v3287_v46 }
 0x244   : > { %v3144_v30 = vpop.f32.mrb[7].mxu1  ;;  %v1677_v22 = vsel %vm1658_vm10, %v4350_v12, -inf  ;;  %v4362_v61 = vmul.f32 %v1641_v39, %v1596_v33  ;;  %v1923_v39 = vsel %vm368_vm0, %v4308_v54, 0.0 }
 0x245   : > { %1672 = vmax.xlane.f32.xlu0 %v1671_v47  ;;  %v2602_v44 = vrot.slane %v922_v19, %v4318_v15 }
 0x246   : > { %v1680_v10 = vsel %vm1658_vm10, %v4362_v61, -inf }
 0x247   : > { %v3289_v31 = vpop.eup %3288 }
 0x248   : > { %v923_v13 = vmul.f32 10.0, %v3289_v31 }
 0x249   : > { %1675 = vmax.xlane.f32.xlu0 %v1674_v49 }
 0x24a   : > { %v2606_v59 = vrot.slane %v923_v13, %v4318_v15 }
 0x24d   : > { %1678 = vmax.xlane.f32.xlu0 %v1677_v22  ;;  %v2598_v22 = vrot.slane %v921_v6, %v4318_v15 }
 0x25a   : > { %v2031_v43 = vpop.f32.mrb[8].mxu0 }
 0x25b   : > { %v4359_v56 = vmul.f32 %v2578_v52, %v2031_v43  ;;  %v3149_v0 = vpop.f32.mrb[9].mxu0 }
 0x25c   : > { %v2107_v48 = vpop.f32.mrb[8].mxu1 }
 0x25d   : > { %v4364_v18 = vmul.f32 %v2582_v34, %v2107_v48  ;;  %v3154_v27 = vpop.f32.mrb[9].mxu1  ;;  %v2623_v63 = vsel %vm1658_vm10, %v4359_v56, -inf }
 0x25e   : > { %v2183_v1 = vpop.f32.mrb[10].mxu0  ;;  %2624 = vmax.xlane.f32.xlu0 %v2623_v63 }
 0x25f   : > { %v4368_v20 = vmul.f32 %v2586_v57, %v2183_v1  ;;  %v3159_v23 = vpop.f32.mrb[11].mxu0  ;;  %v2626_v28 = vsel %vm1658_vm10, %v4364_v18, -inf }
 0x260   : > { %2627 = vmax.xlane.f32.xlu1 %v2626_v28  ;;  %v2259_v45 = vpop.f32.mrb[10].mxu1 }
 0x261   : > { %v3164_v35 = vpop.f32.mrb[11].mxu1  ;;  %v4375_v26 = vmul.f32 %v2590_v41, %v2259_v45  ;;  %v2629_v7 = vsel %vm1658_vm10, %v4368_v20, -inf }
 0x262   : > { %v2335_v58 = vpop.f32.mrb[12].mxu0  ;;  %1681 = vmax.xlane.f32.xlu0 %v1680_v10 }
 0x263   : > { %v3169_v33 = vpop.f32.mrb[13].mxu0  ;;  %v4382_v60 = vmul.f32 %v2594_v32, %v2335_v58  ;;  %v2632_v3 = vsel %vm1658_vm10, %v4375_v26, -inf }
 0x264   : > { %2630 = vmax.xlane.f32.xlu1 %v2629_v7  ;;  %v2411_v30 = vpop.f32.mrb[12].mxu1 }
 0x265   : > { %v3174_v47 = vpop.f32.mrb[13].mxu1  ;;  %v4387_v14 = vmul.f32 %v2598_v22, %v2411_v30  ;;  %v2635_v38 = vsel %vm1658_vm10, %v4382_v60, -inf  ;;  %v1744_v30 = vsub.s32 1, %v4315_v2 }
 0x266   : > { %v2487_v49 = vpop.f32.mrb[14].mxu0  ;;  %956 = vadd.xlane.f32.xlu0 %v955_v11  ;;  %v1737_v47 = vsub.s32 0, %v4315_v2 }
 0x267   : > { %v3179_v16 = vpop.f32.mrb[15].mxu0  ;;  %v4392_v40 = vmul.f32 %v2602_v44, %v2487_v49  ;;  %v2638_v24 = vsel %vm1658_vm10, %v4387_v14, -inf }
 0x268   : > { %2633 = vmax.xlane.f32.xlu1 %v2632_v3  ;;  %v2563_v29 = vpop.f32.mrb[14].mxu1  ;;  %v1751_v3 = vsub.s32 2, %v4315_v2 }
 0x269   : > { %v3184_v62 = vpop.f32.mrb[15].mxu1  ;;  %v4397_v17 = vmul.f32 %v2606_v59, %v2563_v29  ;;  %v2641_v37 = vsel %vm1658_vm10, %v4392_v40, -inf }
 0x26a   : > { %v1758_v62 = vsub.s32 3, %v4315_v2 }
 0x26b   : > { %v2644_v51 = vsel %vm1658_vm10, %v4397_v17, -inf }
 0x26c   : > { %2636 = vmax.xlane.f32.xlu1 %v2635_v38 }
 0x270   : > { %2639 = vmax.xlane.f32.xlu1 %v2638_v24  ;;  %v1765_v24 = vsub.s32 4, %v4315_v2 }
 0x274   : > { %2642 = vmax.xlane.f32.xlu1 %v2641_v37 }
 0x278   : > { %2645 = vmax.xlane.f32.xlu1 %v2644_v51 }
 0x27c   : > { %1924 = vadd.xlane.f32.xlu1 %v1923_v39 }
 0x2c6   : > { %v1661_v52 = vpop.xlane.xlu0 %1660 }
 0x2c7   : > { %v1694_v48 = vrot.slane %v1661_v52, %v4318_v15 }
 0x2c8   : > { %v1664_v57 = vpop.xlane.xlu1 %1663 }
 0x2c9   : > { %v1698_v9 = vrot.slane %v1664_v57, %v4318_v15 }
 0x2ca   : > { %v1667_v34 = vpop.xlane.xlu0 %1666 }
 0x2cb   : > { %v1702_v63 = vrot.slane %v1667_v34, %v4318_v15  ;;  %v1723_v1 = vsel %vm441_vm1, %v1698_v9, %v1694_v48 }
 0x2cd   : > { %v1724_v50 = vsel %vm443_vm2, %v1702_v63, %v1723_v1 }
 0x2ce   : > { %v1670_v5 = vpop.xlane.xlu0 %1669 }
 0x2cf   : > { %v1706_v36 = vrot.slane %v1670_v5, %v4318_v15 }
 0x2d1   : > { %v1725_v35 = vsel %vm445_vm3, %v1706_v36, %v1724_v50  ;;  %v1779_v36 = vsub.s32 6, %v4315_v2 }
 0x2d2   : > { %v1673_v43 = vpop.xlane.xlu0 %1672 }
 0x2d3   : > { %v1710_v23 = vrot.slane %v1673_v43, %v4318_v15 }
 0x2d5   : > { %v1726_v6 = vsel %vm447_vm4, %v1710_v23, %v1725_v35 }
 0x2d6   : > { %v1676_v53 = vpop.xlane.xlu0 %1675 }
 0x2d7   : > { %v1714_v28 = vrot.slane %v1676_v53, %v4318_v15  ;;  %v1772_v53 = vsub.s32 5, %v4315_v2 }
 0x2d9   : > { %v1727_v32 = vsel %vm449_vm5, %v1714_v28, %v1726_v6 }
 0x2da   : > { %v1679_v0 = vpop.xlane.xlu0 %1678 }
 0x2db   : > { %v1718_v45 = vrot.slane %v1679_v0, %v4318_v15 }
 0x2dd   : > { %v1728_v7 = vsel %vm451_vm6, %v1718_v45, %v1727_v32 }
 0x2eb   : > { %v2625_v27 = vpop.xlane.xlu0 %2624 }
 0x2ec   : > { %v2658_v13 = vrot.slane %v2625_v27, %v4318_v15 }
 0x2ed   : > { %v2628_v54 = vpop.xlane.xlu1 %2627 }
 0x2ee   : > { %v2662_v38 = vrot.slane %v2628_v54, %v4318_v15 }
 0x2ef   : > { %v1682_v41 = vpop.xlane.xlu0 %1681 }
 0x2f0   : > { %v1722_v58 = vrot.slane %v1682_v41, %v4318_v15  ;;  %v2687_v37 = vsel %vm441_vm1, %v2662_v38, %v2658_v13 }
 0x2f1   : > { %v2631_v10 = vpop.xlane.xlu1 %2630 }
 0x2f2   : > { %v1729_v49 = vsel %vm453_vm7, %v1722_v58, %v1728_v7  ;;  %v2666_v39 = vrot.slane %v2631_v10, %v4318_v15  ;;  %v1786_v10 = vsub.s32 7, %v4315_v2 }
 0x2f3   : > { %v957_v33 = vpop.xlane.xlu0 %956 }
 0x2f4   : > { %v4419_v46 = vmul.f32 10.0, %v957_v33  ;;  %v2688_v34 = vsel %vm443_vm2, %v2666_v39, %v2687_v37 }
 0x2f5   : > { %v2634_v11 = vpop.xlane.xlu1 %2633 }
 0x2f6   : > { %v4425_v19 = vmax.f32 %v4419_v46, %v1729_v49  ;;  %v2670_v52 = vrot.slane %v2634_v11, %v4318_v15 }
 0x2f8   : > { %v1745_v22 = vrot.slane %v4425_v19, %v1744_v30  ;;  %v1738_v16 = vrot.slane %v4425_v19, %v1737_v47  ;;  %v1752_v29 = vrot.slane %v4425_v19, %v1751_v3  ;;  %v1759_v59 = vrot.slane %v4425_v19, %v1758_v62 }
 0x2f9   : > { %v2637_v31 = vpop.xlane.xlu1 %2636  ;;  %v1766_v43 = vrot.slane %v4425_v19, %v1765_v24  ;;  %v2689_v48 = vsel %vm445_vm3, %v2670_v52, %v2688_v34  ;;  %v1773_v1 = vrot.slane %v4425_v19, %v1772_v53  ;;  %v1780_v35 = vrot.slane %v4425_v19, %v1779_v36 }
 0x2fa   : > { %1747 = vbcast.lane.b32.xlu1 %v1745_v22, 256  ;;  %1740 = vbcast.lane.b32.xlu0 %v1738_v16, 256  ;;  %v2674_v5 = vrot.slane %v2637_v31, %v4318_v15  ;;  %v1787_v6 = vrot.slane %v4425_v19, %v1786_v10 }
 0x2fc   : > { %v2690_v63 = vsel %vm447_vm4, %v2674_v5, %v2689_v48 }
 0x2fd   : > { %v2640_v44 = vpop.xlane.xlu1 %2639 }
 0x2fe   : > { %1754 = vbcast.lane.b32.xlu0 %v1752_v29, 256  ;;  %v2678_v0 = vrot.slane %v2640_v44, %v4318_v15 }
 0x300   : > { %v2691_v54 = vsel %vm449_vm5, %v2678_v0, %v2690_v63 }
 0x301   : > { %v2643_v51 = vpop.xlane.xlu1 %2642 }
 0x302   : > { %1761 = vbcast.lane.b32.xlu0 %v1759_v59, 256  ;;  %v2682_v9 = vrot.slane %v2643_v51, %v4318_v15 }
 0x304   : > { %v2692_v28 = vsel %vm451_vm6, %v2682_v9, %v2691_v54 }
 0x305   : > { %v2646_v57 = vpop.xlane.xlu1 %2645 }
 0x306   : > { %1768 = vbcast.lane.b32.xlu0 %v1766_v43, 256  ;;  %v2686_v27 = vrot.slane %v2646_v57, %v4318_v15 }
 0x308   : > { %v2693_v50 = vsel %vm453_vm7, %v2686_v27, %v2692_v28 }
 0x309   : > { %v1925_v23 = vpop.xlane.xlu1 %1924 }
 0x30a   : > { %v4452_v41 = vmul.f32 10.0, %v1925_v23  ;;  %1775 = vbcast.lane.b32.xlu0 %v1773_v1, 256 }
 0x30c   : > { %v4456_v45 = vmax.f32 %v4452_v41, %v2693_v50 }
 0x30e   : > { %v2702_v58 = vrot.slane %v4456_v45, %v1737_v47  ;;  %1782 = vbcast.lane.b32.xlu0 %v1780_v35, 256  ;;  %v2709_v32 = vrot.slane %v4456_v45, %v1744_v30  ;;  %v2716_v33 = vrot.slane %v4456_v45, %v1751_v3  ;;  %v2723_v7 = vrot.slane %v4456_v45, %v1758_v62 }
 0x30f   : > { %v2730_v11 = vrot.slane %v4456_v45, %v1765_v24  ;;  %v2737_v2 = vrot.slane %v4456_v45, %v1772_v53  ;;  %v2744_v47 = vrot.slane %v4456_v45, %v1779_v36  ;;  %v2751_v49 = vrot.slane %v4456_v45, %v1786_v10 }
 0x310   : > { %2704 = vbcast.lane.b32.xlu1 %v2702_v58, 256 }
 0x312   : > { %1789 = vbcast.lane.b32.xlu0 %v1787_v6, 256 }
 0x314   : > { %2711 = vbcast.lane.b32.xlu1 %v2709_v32, 256 }
 0x318   : > { %2718 = vbcast.lane.b32.xlu1 %v2716_v33, 256 }
 0x31c   : > { %2725 = vbcast.lane.b32.xlu1 %v2723_v7, 256 }
 0x320   : > { %2732 = vbcast.lane.b32.xlu1 %v2730_v11, 256 }
 0x324   : > { %2739 = vbcast.lane.b32.xlu1 %v2737_v2, 256 }
 0x328   : > { %2746 = vbcast.lane.b32.xlu1 %v2744_v47, 256 }
 0x32c   : > { %2753 = vbcast.lane.b32.xlu1 %v2751_v49, 256 }
 0x36c   : > { %v1748_v30 = vpop.permute.xlu1 %1747  ;;  %v1741_v22 = vpop.permute.xlu0 %1740 }
 0x36d   : > { %v1792_v16 = vsub.f32 %v4325_v21, %v1748_v30  ;;  %v1791_v3 = vsub.f32 %v4322_v4, %v1741_v22 }
 0x36f   : > { %v1801_v31 = vmul.f32 1.442695, %v1792_v16  ;;  %v1799_v29 = vmul.f32 1.442695, %v1791_v3 }
 0x370   : > { %v1755_v62 = vpop.permute.xlu0 %1754 }
 0x371   : > { %3290 = vpow2.f32 %v1801_v31  ;;  %v1793_v13 = vsub.f32 %v4330_v25, %v1755_v62 }
 0x372   : > { %3292 = vpow2.f32 %v1799_v29 }
 0x373   : > { %v1803_v44 = vmul.f32 1.442695, %v1793_v13 }
 0x374   : > { %v1762_v38 = vpop.permute.xlu0 %1761 }
 0x375   : > { %3294 = vpow2.f32 %v1803_v44  ;;  %v1794_v59 = vsub.f32 %v4334_v55, %v1762_v38 }
 0x377   : > { %v1805_v24 = vmul.f32 1.442695, %v1794_v59 }
 0x378   : > { %v1769_v37 = vpop.permute.xlu0 %1768 }
 0x379   : > { %3296 = vpow2.f32 %v1805_v24  ;;  %v1795_v51 = vsub.f32 %v4339_v42, %v1769_v37 }
 0x37b   : > { %v3291_v21 = vpop.eup %3290  ;;  %v1807_v39 = vmul.f32 1.442695, %v1795_v51 }
 0x37c   : > { %v3293_v4 = vpop.eup %3292  ;;  %v1776_v52 = vpop.permute.xlu0 %1775  ;;  %v1818_v34 = vsel %vm1658_vm10, %v3291_v21, 0.0 }
 0x37d   : > { %3298 = vpow2.f32 %v1807_v39  ;;  %v1796_v25 = vsub.f32 %v4345_v8, %v1776_v52  ;;  %1819 = vadd.xlane.f32.xlu1 %v1818_v34  ;;  %v1815_v5 = vsel %vm1658_vm10, %v3293_v4, 0.0 }
 0x37e   : > { %1816 = vadd.xlane.f32.xlu0 %v1815_v5 }
 0x37f   : > { %v3295_v43 = vpop.eup %3294  ;;  %v1809_v55 = vmul.f32 1.442695, %v1796_v25 }
 0x380   : > { %v1783_v53 = vpop.permute.xlu0 %1782  ;;  %v1821_v0 = vsel %vm1658_vm10, %v3295_v43, 0.0 }
 0x381   : > { %3300 = vpow2.f32 %v1809_v55  ;;  %v1797_v8 = vsub.f32 %v4350_v12, %v1783_v53 }
 0x382   : > { %v2705_v42 = vpop.permute.xlu1 %2704  ;;  %1822 = vadd.xlane.f32.xlu0 %v1821_v0 }
 0x383   : > { %v3297_v57 = vpop.eup %3296  ;;  %v2755_v9 = vsub.f32 %v4359_v56, %v2705_v42  ;;  %v1811_v50 = vmul.f32 1.442695, %v1797_v8 }
 0x384   : > { %v1824_v48 = vsel %vm1658_vm10, %v3297_v57, 0.0  ;;  %v1790_v1 = vpop.permute.xlu0 %1789 }
 0x385   : > { %v2763_v27 = vmul.f32 1.442695, %v2755_v9  ;;  %v1798_v35 = vsub.f32 %v4362_v61, %v1790_v1 }
 0x386   : > { %v2712_v63 = vpop.permute.xlu1 %2711  ;;  %1825 = vadd.xlane.f32.xlu0 %v1824_v48 }
 0x387   : > { %v3299_v36 = vpop.eup %3298  ;;  %3302 = vpow2.f32 %v2763_v27  ;;  %v2756_v54 = vsub.f32 %v4364_v18, %v2712_v63  ;;  %v1813_v32 = vmul.f32 1.442695, %v1798_v35  ;;  %v1732_v27 = vsub.f32 %v4419_v46, %v4425_v19 }
 0x388   : > { %v1827_v23 = vsel %vm1658_vm10, %v3299_v36, 0.0 }
 0x389   : > { %v2765_v28 = vmul.f32 1.442695, %v2756_v54  ;;  %v1733_v1 = vmul.f32 1.442695, %v1732_v27 }
 0x38a   : > { %v2719_v10 = vpop.permute.xlu1 %2718  ;;  %1828 = vadd.xlane.f32.xlu0 %v1827_v23 }
 0x38b   : > { %v3301_v56 = vpop.eup %3300  ;;  %3304 = vpow2.f32 %v2765_v28  ;;  %v2757_v58 = vsub.f32 %v4368_v20, %v2719_v10 }
 0x38c   : > { %v1830_v12 = vsel %vm1658_vm10, %v3301_v56, 0.0  ;;  %3306 = vpow2.f32 %v1811_v50  ;;  %v2696_v50 = vsub.f32 %v4452_v41, %v4456_v45 }
 0x38d   : > { %v2767_v6 = vmul.f32 1.442695, %v2757_v58 }
 0x38e   : > { %v2726_v33 = vpop.permute.xlu1 %2725  ;;  %1831 = vadd.xlane.f32.xlu0 %v1830_v12 }
 0x38f   : > { %3308 = vpow2.f32 %v2767_v6  ;;  %v2758_v18 = vsub.f32 %v4375_v26, %v2726_v33 }
 0x390   : > { %3310 = vpow2.f32 %v1813_v32 }
 0x391   : > { %v3303_v7 = vpop.eup %3302  ;;  %v2769_v11 = vmul.f32 1.442695, %v2758_v18  ;;  %v2697_v18 = vmul.f32 1.442695, %v2696_v50 }
 0x392   : > { %v2733_v61 = vpop.permute.xlu1 %2732  ;;  %v2779_v2 = vsel %vm1658_vm10, %v3303_v7, 0.0 }
 0x393   : > { %3312 = vpow2.f32 %v2769_v11  ;;  %v2759_v47 = vsub.f32 %v4382_v60, %v2733_v61  ;;  %2780 = vadd.xlane.f32.xlu0 %v2779_v2 }
 0x395   : > { %v3305_v20 = vpop.eup %3304  ;;  %v2771_v49 = vmul.f32 1.442695, %v2759_v47 }
 0x396   : > { %v2740_v30 = vpop.permute.xlu1 %2739  ;;  %v2782_v22 = vsel %vm1658_vm10, %v3305_v20, 0.0  ;;  %v3307_v16 = vpop.eup %3306 }
 0x397   : > { %3314 = vpow2.f32 %v2771_v49  ;;  %v2760_v3 = vsub.f32 %v4387_v14, %v2740_v30  ;;  %2783 = vadd.xlane.f32.xlu0 %v2782_v22  ;;  %v1833_v13 = vsel %vm1658_vm10, %v3307_v16, 0.0 }
 0x399   : > { %v3309_v26 = vpop.eup %3308  ;;  %v2773_v31 = vmul.f32 1.442695, %v2760_v3 }
 0x39a   : > { %v2747_v29 = vpop.permute.xlu1 %2746  ;;  %v2785_v62 = vsel %vm1658_vm10, %v3309_v26, 0.0  ;;  %v3311_v44 = vpop.eup %3310 }
 0x39b   : > { %3316 = vpow2.f32 %v2773_v31  ;;  %v2761_v60 = vsub.f32 %v4392_v40, %v2747_v29  ;;  %2786 = vadd.xlane.f32.xlu1 %v2785_v62  ;;  %1834 = vadd.xlane.f32.xlu0 %v1833_v13  ;;  %v1836_v14 = vsel %vm1658_vm10, %v3311_v44, 0.0 }
 0x39d   : > { %v3313_v38 = vpop.eup %3312  ;;  %v2775_v59 = vmul.f32 1.442695, %v2761_v60 }
 0x39e   : > { %v2754_v24 = vpop.permute.xlu1 %2753  ;;  %v2788_v37 = vsel %vm1658_vm10, %v3313_v38, 0.0 }
 0x39f   : > { %3318 = vpow2.f32 %v2775_v59  ;;  %v2762_v51 = vsub.f32 %v4397_v17, %v2754_v24  ;;  %2789 = vadd.xlane.f32.xlu1 %v2788_v37  ;;  %1837 = vadd.xlane.f32.xlu0 %v1836_v14 }
 0x3a1   : > { %v3315_v21 = vpop.eup %3314  ;;  %v2777_v39 = vmul.f32 1.442695, %v2762_v51 }
 0x3a2   : > { %v2791_v4 = vsel %vm1658_vm10, %v3315_v21, 0.0 }
 0x3a3   : > { %3320 = vpow2.f32 %v2777_v39  ;;  %2792 = vadd.xlane.f32.xlu1 %v2791_v4 }
 0x3a4   : > { %3322 = vpow2.f32 %v1733_v1 }
 0x3a5   : > { %v3317_v40 = vpop.eup %3316  ;;  %3324 = vpow2.f32 %v2697_v18 }
 0x3a6   : > { %v2794_v52 = vsel %vm1658_vm10, %v3317_v40, 0.0 }
 0x3a7   : > { %2795 = vadd.xlane.f32.xlu1 %v2794_v52 }
 0x3a9   : > { %v3319_v34 = vpop.eup %3318 }
 0x3aa   : > { %v2797_v25 = vsel %vm1658_vm10, %v3319_v34, 0.0 }
 0x3ab   : > { %2798 = vadd.xlane.f32.xlu1 %v2797_v25 }
 0x3ad   : > { %v3321_v5 = vpop.eup %3320 }
 0x3ae   : > { %v2800_v43 = vsel %vm1658_vm10, %v3321_v5, 0.0  ;;  %v3323_v26 = vpop.eup %3322 }
 0x3af   : > { %2801 = vadd.xlane.f32.xlu1 %v2800_v43  ;;  %v3325_v39 = vpop.eup %3324 }
 0x40a   : > { %v1820_v9 = vpop.xlane.xlu1 %1819 }
 0x40b   : > { %v1817_v17 = vpop.xlane.xlu0 %1816  ;;  %v1854_v36 = vrot.slane %v1820_v9, %v4318_v15 }
 0x40c   : > { %v1850_v54 = vrot.slane %v1817_v17, %v4318_v15 }
 0x40e   : > { %v1879_v58 = vsel %vm441_vm1, %v1854_v36, %v1850_v54 }
 0x40f   : > { %v1823_v55 = vpop.xlane.xlu0 %1822 }
 0x410   : > { %v1858_v23 = vrot.slane %v1823_v55, %v4318_v15 }
 0x412   : > { %v1880_v6 = vsel %vm443_vm2, %v1858_v23, %v1879_v58 }
 0x413   : > { %v1826_v53 = vpop.xlane.xlu0 %1825 }
 0x414   : > { %v1862_v35 = vrot.slane %v1826_v53, %v4318_v15 }
 0x416   : > { %v1881_v7 = vsel %vm445_vm3, %v1862_v35, %v1880_v6 }
 0x417   : > { %v1829_v0 = vpop.xlane.xlu0 %1828 }
 0x418   : > { %v1866_v10 = vrot.slane %v1829_v0, %v4318_v15 }
 0x41a   : > { %v1882_v2 = vsel %vm447_vm4, %v1866_v10, %v1881_v7 }
 0x41b   : > { %v1832_v42 = vpop.xlane.xlu0 %1831 }
 0x41c   : > { %v1870_v12 = vrot.slane %v1832_v42, %v4318_v15 }
 0x41e   : > { %v1883_v47 = vsel %vm449_vm5, %v1870_v12, %v1882_v2 }
 0x420   : > { %v2781_v57 = vpop.xlane.xlu0 %2780 }
 0x421   : > { %v2814_v20 = vrot.slane %v2781_v57, %v4318_v15 }
 0x424   : > { %v2784_v48 = vpop.xlane.xlu0 %2783 }
 0x425   : > { %v2818_v11 = vrot.slane %v2784_v48, %v4318_v15 }
 0x427   : > { %v2843_v22 = vsel %vm441_vm1, %v2818_v11, %v2814_v20 }
 0x428   : > { %v2787_v8 = vpop.xlane.xlu1 %2786  ;;  %v1835_v63 = vpop.xlane.xlu0 %1834 }
 0x429   : > { %v1874_v32 = vrot.slane %v1835_v63, %v4318_v15  ;;  %v2822_v3 = vrot.slane %v2787_v8, %v4318_v15 }
 0x42b   : > { %v1884_v49 = vsel %vm451_vm6, %v1874_v32, %v1883_v47  ;;  %v2844_v29 = vsel %vm443_vm2, %v2822_v3, %v2843_v22 }
 0x42c   : > { %v2790_v28 = vpop.xlane.xlu1 %2789  ;;  %v1838_v56 = vpop.xlane.xlu0 %1837 }
 0x42d   : > { %v1878_v61 = vrot.slane %v1838_v56, %v4318_v15  ;;  %v2826_v31 = vrot.slane %v2790_v28, %v4318_v15 }
 0x42f   : > { %v1885_v16 = vsel %vm453_vm7, %v1878_v61, %v1884_v49  ;;  %v2845_v59 = vsel %vm445_vm3, %v2826_v31, %v2844_v29 }
 0x430   : > { %v2793_v33 = vpop.xlane.xlu1 %2792  ;;  %v1887_v13 = vadd.f32 %v3323_v26, %v1885_v16 }
 0x431   : > { %v2830_v62 = vrot.slane %v2793_v33, %v4318_v15 }
 0x432   : > { %3326 = vlog2.f32 %v1887_v13 }
 0x433   : > { %v2846_v24 = vsel %vm447_vm4, %v2830_v62, %v2845_v59 }
 0x434   : > { %v2796_v30 = vpop.xlane.xlu1 %2795 }
 0x435   : > { %v2834_v60 = vrot.slane %v2796_v30, %v4318_v15 }
 0x437   : > { %v2847_v14 = vsel %vm449_vm5, %v2834_v60, %v2846_v24 }
 0x438   : > { %v2799_v44 = vpop.xlane.xlu1 %2798 }
 0x439   : > { %v2838_v38 = vrot.slane %v2799_v44, %v4318_v15 }
 0x43b   : > { %v2848_v21 = vsel %vm451_vm6, %v2838_v38, %v2847_v14 }
 0x43c   : > { %v2802_v37 = vpop.xlane.xlu1 %2801  ;;  %v3327_v52 = vpop.eup %3326 }
 0x43d   : > { %v2842_v51 = vrot.slane %v2802_v37, %v4318_v15  ;;  %v1889_v34 = vmul.f32 0.6931472, %v3327_v52 }
 0x43f   : > { %v2849_v4 = vsel %vm453_vm7, %v2842_v51, %v2848_v21  ;;  %v1890_v5 = vadd.f32 %v1889_v34, %v4425_v19 }
 0x440   : > { %v2851_v40 = vadd.f32 %v3325_v39, %v2849_v4 }
 0x441   : > { %v1891_v55 = vsub.f32 %v1890_v5, %v4419_v46 }
 0x442   : > { %3328 = vlog2.f32 %v2851_v40 }
 0x44c   : > { %v3329_v25 = vpop.eup %3328 }
 0x44d   : > { %v2853_v43 = vmul.f32 0.6931472, %v3329_v25 }
 0x44f   : > { %v2854_v17 = vadd.f32 %v2853_v43, %v4456_v45 }
 0x451   : > { %v2855_v53 = vsub.f32 %v2854_v17, %v4452_v41 }
 0x453   : > { %v2856_v0 = vadd.f32 %v2855_v53, %v1891_v55 }
 0x455   : > { %v2858_v42 = vsel %vm2857_vm11, %v2856_v0, 0.0 }
 0x456   : > { %2859 = vadd.xlane.f32.xlu0 %v2858_v42 }
 0x4e3   : > { %v2860_v57 = vpop.xlane.xlu0 %2859 }
 0x4e4   : > { %v2865_v19 = vrot.slane %v2860_v57, %v4318_v15 }
 0x4e6   : > { %2868 = vst.msk [vmem:[%s331_s24] sm:$0x1] %vm2867_vm12, %v2865_v19 }
 0x4e7   : > { %3469 = shalt.err (!%p3466_p5)
}
 0x4e8   : > { %s3470_s14 = scalar_lea.hbm %s4545_s6, 16  ;;  %s3474_s5 = scalar_lea.hbm %s4593_s4, 32 }
 0x4e9   : > { %p3471_p1 = scmp.ne.s32.totalorder %s4545_s6, %s3470_s14  ;;  %p3475_p12 = scmp.lt.u32.totalorder %s4545_s6, %s4593_s4 }
 0x4ea   : > { %p3476_p2 = scmp.lt.u32.totalorder %s3474_s5, %s3470_s14  ;;  %p3478_p13 = scmp.lt.u32.totalorder %s3470_s14, %s4545_s6 }
 0x4eb   : > { %p3472_p7 = pnand %p3471_p1, %p4628_p0 }
 0x4ec   : > { %p3477_p6 = por %p3476_p2, %p3475_p12 }
 0x4ed   : > { %p3473_p9 = pneg %p3472_p7 }
 0x4ee   : > { %p3479_p8 = por %p3478_p13, %p3477_p6 }
 0x4f0   : > { %p3480_p10 = pnand %p3479_p8, %p3473_p9 }
 0x4f2   : > { %3483 = shalt.err (!%p3480_p10)
}
 0x4f3   : > { %3193 = dma.vmem_to_hbm [thread:$0]  (%p4628_p0), %s4547_s20, 16, %s4545_s6, %s2870_s30  }
 0x4f4 PF: > { %s2894_s13 = sand.u32 1, %s3518_s15   ;;  %p4629_p11 = scmp.ne.s32.totalorder %s4609_s27, 0 }
 0x4f5   : > { %p4630_p4 = scmp.ge.s32.totalorder %s3530_s18, 2  ;;  %s2895_s23 = scalar_lea.sflag [#allocation4], %s2894_s13 }
 0x4f7   : > { %p3209_p3 = pnand %p4630_p4, %p4629_p11 }
 0x4f9   : > { %3513 = dma.done.wait (!%p3209_p3), %s2895_s23, 16  }
 0x4fa   : > { %3515 = vsyncadd (!%p3209_p3), %s2895_s23, 4294967280  ;;  %s4631_s9 = sld [smem:[#allocation15_spill]]  ;;  %p23_p5 = scmp.ge.s32.totalorder %s3591_s21, 4  }
 0x4fb   : > { %s4632_s15 = smov %s3522_s16  ;;  %s4633_s16 = smov %s3526_s17 }
 0x4fc   : > { %s4635_s18 = smov %s3591_s21  ;;  %25 = sbr.rel (!%p23_p5) target bundleno = 12 (0xc), region = 118 }
 0x500   : > { %s4634_s17 = smov %s4631_s9 }
 0x503   :  { %2899 = vsyncpa [#allocation3], 1 }
 0x504   :  { %2901 = vsyncpa [#allocation3 + $0x1], 1 }
 0x505   :  { %2902 = vsyncpa [#allocation6], 1 }
 0x506   :  { %2904 = vsyncpa [#allocation6 + $0x1], 1 }
 0x507   :  { %2905 = vsyncpa [#allocation9], 1 }
 0x508   :  { %2907 = vsyncpa [#allocation9 + $0x1], 1 }
 0x509   :  { %2908 = vsyncpa [#allocation4], 1 }
 0x50a   :  { %2910 = vsyncpa [#allocation4 + $0x1], 1 }

</bundles_post_ra>
